<compile_context>
chip_gen: v7x
topology: tpu7x:2x2x1
jax: 0.10.0
libtpu: 0.0.40
codegen_flags: <defaults>
</compile_context>

<pallas_src>
import jax
import jax.numpy as jnp
from jax.experimental import pallas as pl
from jax.experimental.pallas import tpu as pltpu

EPS = 1e-5
LANE = 128


# ----------------------------- small helpers --------------------------------
def _round_up(x, m):
    return (x + m - 1) // m * m


def _pick_batch_tile(n):
    """Largest 8-aligned batch tile <= 512 that divides n, preferring >=2 tiles
    so the 'parallel' grid can shard across megacore TCs; else the full batch."""
    for tm in (512, 256, 128, 64, 32, 16, 8):
        if 2 * tm <= n and n % tm == 0:
            return tm
    for tm in (512, 256, 128, 64, 32, 16, 8):
        if tm <= n and n % tm == 0:
            return tm
    return n


def _pad2d(a, rows, cols):
    r, c = a.shape
    return jnp.pad(a, ((0, rows - r), (0, cols - c)))


def _pad_row(v, cols):
    return jnp.pad(v.reshape(1, -1), ((0, 0), (0, cols - v.shape[0])))


# ----------------------------- in-kernel math --------------------------------
def _tile_stats(h):
    """Per-feature (sum, sum_sq) of this batch tile, f32, shape (2, D)."""
    return jnp.concatenate(
        [jnp.sum(h, axis=0, keepdims=True),
         jnp.sum(h * h, axis=0, keepdims=True)], axis=0)


# ------------------------------- kernels -------------------------------------
def _stage1_kernel(x_ref, w1_ref, b1_ref, h1_ref, part_ref):
    xb = x_ref[...].astype(jnp.bfloat16)                      # bf16 MXU operand
    h1 = jnp.dot(xb, w1_ref[...], preferred_element_type=jnp.float32) + b1_ref[...]
    h1_ref[...] = h1
    part_ref[...] = _tile_stats(h1)[None, :, :]


def _stage2_kernel(h1_ref, sc1_ref, sh1_ref, w2_ref, b2_ref, h2_ref, part_ref):
    a1 = jnp.maximum(h1_ref[...] * sc1_ref[...] + sh1_ref[...], 0.0)   # BN1 + ReLU
    h2 = jnp.dot(a1.astype(jnp.bfloat16), w2_ref[...],
                 preferred_element_type=jnp.float32) + b2_ref[...]
    h2_ref[...] = h2
    part_ref[...] = _tile_stats(h2)[None, :, :]


def _stage3_map_kernel(h2_ref, x_ref, sc2_ref, sh2_ref, wm_ref, bm_ref,
                       ypre_ref, part_ref):
    h2n = h2_ref[...] * sc2_ref[...] + sh2_ref[...]                    # BN2
    ident = jnp.dot(x_ref[...].astype(jnp.bfloat16), wm_ref[...],
                    preferred_element_type=jnp.float32) + bm_ref[...]  # dim_map
    y_pre = ident + h2n
    ypre_ref[...] = y_pre
    part_ref[...] = _tile_stats(y_pre)[None, :, :]


def _stage3_nomap_kernel(h2_ref, x_ref, sc2_ref, sh2_ref, ypre_ref, part_ref):
    h2n = h2_ref[...] * sc2_ref[...] + sh2_ref[...]                    # BN2
    y_pre = x_ref[...].astype(jnp.float32) + h2n                       # identity = x
    ypre_ref[...] = y_pre
    part_ref[...] = _tile_stats(y_pre)[None, :, :]


def _stage4_kernel(ypre_ref, scf_ref, shf_ref, o_ref):
    y = ypre_ref[...] * scf_ref[...] + shf_ref[...]                    # final BN
    o_ref[...] = jnp.maximum(y, 0.0).astype(o_ref.dtype)               # ReLU


# ------------------------------ parameters -----------------------------------
def init_params(key, input_dim, output_dim):
    """Synthetic parameters matching the torch module's shapes (torch layout)."""
    ks = jax.random.split(key, 6)
    p = {}
    p["w1"] = jax.random.normal(ks[0], (output_dim, input_dim), jnp.float32) * 0.1
    p["b1"] = jax.random.normal(ks[1], (output_dim,), jnp.float32) * 0.1
    p["w2"] = jax.random.normal(ks[2], (output_dim, output_dim), jnp.float32) * 0.1
    p["b2"] = jax.random.normal(ks[3], (output_dim,), jnp.float32) * 0.1
    if input_dim != output_dim:                                # dim_map Linear
        p["wm"] = jax.random.normal(ks[4], (output_dim, input_dim), jnp.float32) * 0.1
        p["bm"] = jax.random.normal(ks[5], (output_dim,), jnp.float32) * 0.1
    for name in ("bn1", "bn2", "bnf"):                         # torch default init
        p[f"{name}_g"] = jnp.ones((output_dim,), jnp.float32)
        p[f"{name}_b"] = jnp.zeros((output_dim,), jnp.float32)
    return p


def prepare_params(params):
    """One-time prep: pad to 128-lane multiples, pre-transpose to (D_in, D_out),
    cast MXU weight operands to bf16.  Do this once, outside the step."""
    output_dim, input_dim = params["w1"].shape
    din_p = _round_up(input_dim, LANE)
    d_p = _round_up(output_dim, LANE)
    prep = {
        "input_dim": input_dim, "output_dim": output_dim,
        "din_p": din_p, "d_p": d_p,
        "use_dim_map": input_dim != output_dim,
        "w1": _pad2d(params["w1"].T, din_p, d_p).astype(jnp.bfloat16),
        "b1": _pad_row(params["b1"], d_p),
        "w2": _pad2d(params["w2"].T, d_p, d_p).astype(jnp.bfloat16),
        "b2": _pad_row(params["b2"], d_p),
        "g1": _pad_row(params["bn1_g"], d_p), "be1": _pad_row(params["bn1_b"], d_p),
        "g2": _pad_row(params["bn2_g"], d_p), "be2": _pad_row(params["bn2_b"], d_p),
        "gf": _pad_row(params["bnf_g"], d_p), "bef": _pad_row(params["bnf_b"], d_p),
    }
    if prep["use_dim_map"]:
        prep["wm"] = _pad2d(params["wm"].T, din_p, d_p).astype(jnp.bfloat16)
        prep["bm"] = _pad_row(params["bm"], d_p)
    return prep


# ---------------------- BN affine from partial statistics ---------------------
def _bn_affine(partials, gamma, beta, inv_n):
    """Reduce per-tile (sum, sum_sq) partials -> per-feature scale/shift so the
    next kernel applies BN as a single fused multiply-add.
    var = E[h^2] - E[h]^2 (biased), clamped >= 0 to guard tiny cancellation."""
    stats = jnp.sum(partials, axis=0)                          # (2, D)
    mu = stats[0:1, :] * inv_n
    var = jnp.maximum(stats[1:2, :] * inv_n - mu * mu, 0.0)
    scale = gamma * jax.lax.rsqrt(var + EPS)
    shift = beta - mu * scale
    return scale, shift


# ------------------------------- forward --------------------------------------
def resnet_block_forward(x, prep):
    n, input_dim = x.shape
    assert input_dim == prep["input_dim"], "input feature dim mismatch"
    output_dim, din_p, d_p = prep["output_dim"], prep["din_p"], prep["d_p"]

    tm = _pick_batch_tile(n)
    num_tiles = n // tm
    inv_n = 1.0 / n

    x_p = _pad2d(x.astype(jnp.float32), n, din_p)              # lane-pad features

    def tile_spec(cols):                                        # streamed activations
        return pl.BlockSpec((tm, cols), lambda t: (t, 0))

    def const_spec(shape):                                      # VMEM-resident params
        return pl.BlockSpec(shape, lambda t, _s=shape: tuple(0 for _ in _s))

    part_spec = pl.BlockSpec((1, 2, d_p), lambda t: (t, 0, 0))  # per-tile partial stats

    act = jax.ShapeDtypeStruct((n, d_p), jnp.float32)
    part = jax.ShapeDtypeStruct((num_tiles, 2, d_p), jnp.float32)

    cparams = pltpu.CompilerParams(
        dimension_semantics=("parallel",), vmem_limit_bytes=32 * 1024 * 1024)

    # ---- stage 1: h1 = x @ W1 + b1 ; per-tile sum/ssq(h1) ----
    h1, p1 = pl.pallas_call(
        _stage1_kernel,
        grid=(num_tiles,),
        in_specs=[tile_spec(din_p), const_spec((din_p, d_p)), const_spec((1, d_p))],
        out_specs=[tile_spec(d_p), part_spec],
        out_shape=[act, part],
        compiler_params=cparams,
        cost_estimate=pl.CostEstimate(
            flops=2 * n * din_p * d_p, transcendentals=0,
            bytes_accessed=4 * n * (din_p + d_p) + 2 * din_p * d_p),
    )(x_p, prep["w1"], prep["b1"])
    sc1, sh1 = _bn_affine(p1, prep["g1"], prep["be1"], inv_n)

    # ---- stage 2: h2 = relu(BN1(h1)) @ W2 + b2 ; per-tile sum/ssq(h2) ----
    h2, p2 = pl.pallas_call(
        _stage2_kernel,
        grid=(num_tiles,),
        in_specs=[tile_spec(d_p), const_spec((1, d_p)), const_spec((1, d_p)),
                  const_spec((d_p, d_p)), const_spec((1, d_p))],
        out_specs=[tile_spec(d_p), part_spec],
        out_shape=[act, part],
        compiler_params=cparams,
        cost_estimate=pl.CostEstimate(
            flops=2 * n * d_p * d_p, transcendentals=0,
            bytes_accessed=8 * n * d_p + 2 * d_p * d_p),
    )(h1, sc1, sh1, prep["w2"], prep["b2"])
    sc2, sh2 = _bn_affine(p2, prep["g2"], prep["be2"], inv_n)

    # ---- stage 3: y_pre = dim_map(x) + BN2(h2) ; per-tile sum/ssq(y_pre) ----
    if prep["use_dim_map"]:
        y_pre, pf = pl.pallas_call(
            _stage3_map_kernel,
            grid=(num_tiles,),
            in_specs=[tile_spec(d_p), tile_spec(din_p), const_spec((1, d_p)),
                      const_spec((1, d_p)), const_spec((din_p, d_p)),
                      const_spec((1, d_p))],
            out_specs=[tile_spec(d_p), part_spec],
            out_shape=[act, part],
            compiler_params=cparams,
            cost_estimate=pl.CostEstimate(
                flops=2 * n * din_p * d_p, transcendentals=0,
                bytes_accessed=4 * n * (din_p + 2 * d_p) + 2 * din_p * d_p),
        )(h2, x_p, sc2, sh2, prep["wm"], prep["bm"])
    else:  # identity = x (no eye-matrix matmul)
        y_pre, pf = pl.pallas_call(
            _stage3_nomap_kernel,
            grid=(num_tiles,),
            in_specs=[tile_spec(d_p), tile_spec(din_p), const_spec((1, d_p)),
                      const_spec((1, d_p))],
            out_specs=[tile_spec(d_p), part_spec],
            out_shape=[act, part],
            compiler_params=cparams,
        )(h2, x_p, sc2, sh2)
    scf, shf = _bn_affine(pf, prep["gf"], prep["bef"], inv_n)

    # ---- stage 4: y = relu(final_BN(y_pre)) ---- (pure elementwise, parallel)
    out_p = pl.pallas_call(
        _stage4_kernel,
        grid=(num_tiles,),
        in_specs=[tile_spec(d_p), const_spec((1, d_p)), const_spec((1, d_p))],
        out_specs=tile_spec(d_p),
        out_shape=jax.ShapeDtypeStruct((n, d_p), x.dtype),
        compiler_params=cparams,
    )(y_pre, scf, shf)

    return out_p[:, :output_dim]                               # strip lane padding


# ------------------------------ reference -------------------------------------
def resnet_block_reference(x, params, *, mxu_bf16=True):
    """Pure-JAX reference. mxu_bf16=True mirrors the kernel (bf16 MXU operands,
    f32 accumulate/BN); mxu_bf16=False is the exact f32 module semantics."""
    dt = jnp.bfloat16 if mxu_bf16 else jnp.float32

    def mm(a, w):      # torch-layout weight (out, in)
        return jnp.dot(a.astype(dt), w.T.astype(dt), preferred_element_type=jnp.float32)

    def bn(h, gamma, beta):
        mu = jnp.mean(h, axis=0, keepdims=True)
        var = jnp.maximum(jnp.mean(h * h, axis=0, keepdims=True) - mu * mu, 0.0)
        return (h - mu) * (jax.lax.rsqrt(var + EPS) * gamma) + beta

    xf = x.astype(jnp.float32)
    h = mm(xf, params["w1"]) + params["b1"]
    h = jnp.maximum(bn(h, params["bn1_g"], params["bn1_b"]), 0.0)
    h = mm(h, params["w2"]) + params["b2"]
    h = bn(h, params["bn2_g"], params["bn2_b"])
    identity = mm(xf, params["wm"]) + params["bm"] if "wm" in params else xf
    y = bn(identity + h, params["bnf_g"], params["bnf_b"])
    return jnp.maximum(y, 0.0)


# --------------------------------- demo ----------------------------------------
if __name__ == "__main__":
    INPUT_DIM, OUTPUT_DIM, BATCH = 16, 32, 256   # 2 batch tiles of 128 rows

    key = jax.random.PRNGKey(0)
    kx, kp = jax.random.split(key)
    x = jax.random.normal(kx, (BATCH, INPUT_DIM), jnp.float32)
    params = init_params(kp, INPUT_DIM, OUTPUT_DIM)
    prep = prepare_params(params)                 # one-time pad/transpose/bf16 cast

    fwd = jax.jit(lambda xx: resnet_block_forward(xx, prep))
    out = jax.block_until_ready(fwd(x))
    assert out.shape == (BATCH, OUTPUT_DIM)
    assert bool(jnp.all(jnp.isfinite(out)))

    # Mirror reference (same bf16 MXU operands, f32 BN): tight-ish elementwise check.
    ref = jax.block_until_ready(resnet_block_reference(x, params, mxu_bf16=True))
    assert jnp.allclose(out, ref, atol=2e-2, rtol=2e-2), "mismatch vs bf16-MXU reference"

    # Exact f32 module semantics: bf16-operand error budget, norm-wise check.
    ref32 = jax.block_until_ready(resnet_block_reference(x, params, mxu_bf16=False))
    rel = float(jnp.linalg.norm(out - ref32) / jnp.linalg.norm(ref32))
    assert rel < 5e-2, f"relative error vs f32 reference too large: {rel}"

    print("KERNEL_OK")
</pallas_src>

<mosaic_0001>
module attributes {stable_mosaic.version = 11 : i64} {
  func.func @_stage1_kernel(%arg0: i32, %arg1: memref<128x128xf32, #tpu.memory_space<vmem>>, %arg2: memref<128x128xbf16, #tpu.memory_space<vmem>>, %arg3: memref<1x128xf32, #tpu.memory_space<vmem>>, %arg4: memref<128x128xf32, #tpu.memory_space<vmem>>, %arg5: memref<1x2x128xf32, #tpu.memory_space<vmem>>) attributes {dimension_semantics = [#tpu.dimension_semantics<parallel>], iteration_bounds = array<i64: 2>, scalar_prefetch = 0 : i64, scratch_operands = 0 : i64, tpu.core_type = #tpu.core_type<tc>, window_params = [{transform_indices = @transform_0, window_bounds = array<i64: 128, 128>}, {pipeline_mode = #tpu.pipeline_mode<synchronous>, transform_indices = @transform_1, window_bounds = array<i64: 128, 128>}, {pipeline_mode = #tpu.pipeline_mode<synchronous>, transform_indices = @transform_2, window_bounds = array<i64: 1, 128>}, {transform_indices = @transform_3, window_bounds = array<i64: 128, 128>}, {transform_indices = @transform_4, window_bounds = array<i64: 1, 2, 128>}]} {
    %c0 = arith.constant 0 : index
    %c0_0 = arith.constant 0 : index
    %0 = vector.load %arg1[%c0, %c0_0] : memref<128x128xf32, #tpu.memory_space<vmem>>, vector<128x128xf32>
    %1 = arith.truncf %0 : vector<128x128xf32> to vector<128x128xbf16>
    %c0_1 = arith.constant 0 : index
    %c0_2 = arith.constant 0 : index
    %2 = vector.load %arg2[%c0_1, %c0_2] : memref<128x128xbf16, #tpu.memory_space<vmem>>, vector<128x128xbf16>
    %cst = arith.constant dense<0.000000e+00> : vector<128x128xf32>
    %3 = tpu.matmul %1, %2, %cst {dimension_numbers = #tpu.dot_dimension_numbers<[1], [0], [0], [1], [0, 0, 1, 1], [], []>} : vector<128x128xbf16>, vector<128x128xbf16>, vector<128x128xf32> -> vector<128x128xf32>
    %c0_3 = arith.constant 0 : index
    %c0_4 = arith.constant 0 : index
    %4 = vector.load %arg3[%c0_3, %c0_4] : memref<1x128xf32, #tpu.memory_space<vmem>>, vector<1x128xf32>
    %5 = vector.broadcast %4 : vector<1x128xf32> to vector<128x128xf32>
    %6 = arith.addf %3, %5 : vector<128x128xf32>
    %c0_5 = arith.constant 0 : index
    %c0_6 = arith.constant 0 : index
    %7 = vector.load %arg4[%c0_5, %c0_6] : memref<128x128xf32, #tpu.memory_space<vmem>>, vector<128x128xf32>
    tpu.vector_store %arg4[%c0_5, %c0_6], %6 {strides = array<i32>} : memref<128x128xf32, #tpu.memory_space<vmem>>, vector<128x128xf32>,
    %cst_7 = arith.constant dense<0.000000e+00> : vector<128xf32>
    %8 = vector.multi_reduction <add>, %6, %cst_7 [0] : vector<128x128xf32> to vector<128xf32>
    %9 = vector.shape_cast %8 : vector<128xf32> to vector<1x128xf32>
    %10 = arith.mulf %6, %6 : vector<128x128xf32>
    %cst_8 = arith.constant dense<0.000000e+00> : vector<128xf32>
    %11 = vector.multi_reduction <add>, %10, %cst_8 [0] : vector<128x128xf32> to vector<128xf32>
    %12 = vector.shape_cast %11 : vector<128xf32> to vector<1x128xf32>
    %13 = tpu.concatenate %9, %12 in 0 : vector<1x128xf32>, vector<1x128xf32> -> vector<2x128xf32>
    %14 = vector.shape_cast %13 : vector<2x128xf32> to vector<1x2x128xf32>
    %c0_9 = arith.constant 0 : index
    %c0_10 = arith.constant 0 : index
    %c0_11 = arith.constant 0 : index
    %15 = vector.load %arg5[%c0_9, %c0_10, %c0_11] : memref<1x2x128xf32, #tpu.memory_space<vmem>>, vector<1x2x128xf32>
    tpu.vector_store %arg5[%c0_9, %c0_10, %c0_11], %14 {strides = array<i32>} : memref<1x2x128xf32, #tpu.memory_space<vmem>>, vector<1x2x128xf32>,
    return
  }
  func.func @transform_0(%arg0: i32) -> (i32, i32) {
    %c0_i32 = arith.constant 0 : i32
    %c0_i32_0 = arith.constant 0 : i32
    return %arg0, %c0_i32 : i32, i32
  }
  func.func @transform_1(%arg0: i32) -> (i32, i32) {
    %c0_i32 = arith.constant 0 : i32
    %c0_i32_0 = arith.constant 0 : i32
    %c0_i32_1 = arith.constant 0 : i32
    return %c0_i32, %c0_i32_0 : i32, i32
  }
  func.func @transform_2(%arg0: i32) -> (i32, i32) {
    %c0_i32 = arith.constant 0 : i32
    %c0_i32_0 = arith.constant 0 : i32
    %c0_i32_1 = arith.constant 0 : i32
    return %c0_i32, %c0_i32_0 : i32, i32
  }
  func.func @transform_3(%arg0: i32) -> (i32, i32) {
    %c0_i32 = arith.constant 0 : i32
    %c0_i32_0 = arith.constant 0 : i32
    return %arg0, %c0_i32 : i32, i32
  }
  func.func @transform_4(%arg0: i32) -> (i32, i32, i32) {
    %c0_i32 = arith.constant 0 : i32
    %c0_i32_0 = arith.constant 0 : i32
    %c0_i32_1 = arith.constant 0 : i32
    return %arg0, %c0_i32, %c0_i32_0 : i32, i32, i32
  }
}

module attributes {stable_mosaic.version = 11 : i64} {
  func.func @_stage2_kernel(%arg0: i32, %arg1: memref<128x128xf32, #tpu.memory_space<vmem>>, %arg2: memref<1x128xf32, #tpu.memory_space<vmem>>, %arg3: memref<1x128xf32, #tpu.memory_space<vmem>>, %arg4: memref<128x128xbf16, #tpu.memory_space<vmem>>, %arg5: memref<1x128xf32, #tpu.memory_space<vmem>>, %arg6: memref<128x128xf32, #tpu.memory_space<vmem>>, %arg7: memref<1x2x128xf32, #tpu.memory_space<vmem>>) attributes {dimension_semantics = [#tpu.dimension_semantics<parallel>], iteration_bounds = array<i64: 2>, scalar_prefetch = 0 : i64, scratch_operands = 0 : i64, tpu.core_type = #tpu.core_type<tc>, window_params = [{transform_indices = @transform_0, window_bounds = array<i64: 128, 128>}, {pipeline_mode = #tpu.pipeline_mode<synchronous>, transform_indices = @transform_1, window_bounds = array<i64: 1, 128>}, {pipeline_mode = #tpu.pipeline_mode<synchronous>, transform_indices = @transform_2, window_bounds = array<i64: 1, 128>}, {pipeline_mode = #tpu.pipeline_mode<synchronous>, transform_indices = @transform_3, window_bounds = array<i64: 128, 128>}, {pipeline_mode = #tpu.pipeline_mode<synchronous>, transform_indices = @transform_4, window_bounds = array<i64: 1, 128>}, {transform_indices = @transform_5, window_bounds = array<i64: 128, 128>}, {transform_indices = @transform_6, window_bounds = array<i64: 1, 2, 128>}]} {
    %c0 = arith.constant 0 : index
    %c0_0 = arith.constant 0 : index
    %0 = vector.load %arg1[%c0, %c0_0] : memref<128x128xf32, #tpu.memory_space<vmem>>, vector<128x128xf32>
    %c0_1 = arith.constant 0 : index
    %c0_2 = arith.constant 0 : index
    %1 = vector.load %arg2[%c0_1, %c0_2] : memref<1x128xf32, #tpu.memory_space<vmem>>, vector<1x128xf32>
    %2 = vector.broadcast %1 : vector<1x128xf32> to vector<128x128xf32>
    %3 = arith.mulf %0, %2 : vector<128x128xf32>
    %c0_3 = arith.constant 0 : index
    %c0_4 = arith.constant 0 : index
    %4 = vector.load %arg3[%c0_3, %c0_4] : memref<1x128xf32, #tpu.memory_space<vmem>>, vector<1x128xf32>
    %5 = vector.broadcast %4 : vector<1x128xf32> to vector<128x128xf32>
    %6 = arith.addf %3, %5 : vector<128x128xf32>
    %cst = arith.constant 0.000000e+00 : f32
    %7 = vector.broadcast %cst : f32 to vector<128x128xf32>
    %8 = arith.maximumf %6, %7 : vector<128x128xf32>
    %9 = arith.truncf %8 : vector<128x128xf32> to vector<128x128xbf16>
    %c0_5 = arith.constant 0 : index
    %c0_6 = arith.constant 0 : index
    %10 = vector.load %arg4[%c0_5, %c0_6] : memref<128x128xbf16, #tpu.memory_space<vmem>>, vector<128x128xbf16>
    %cst_7 = arith.constant dense<0.000000e+00> : vector<128x128xf32>
    %11 = tpu.matmul %9, %10, %cst_7 {dimension_numbers = #tpu.dot_dimension_numbers<[1], [0], [0], [1], [0, 0, 1, 1], [], []>} : vector<128x128xbf16>, vector<128x128xbf16>, vector<128x128xf32> -> vector<128x128xf32>
    %c0_8 = arith.constant 0 : index
    %c0_9 = arith.constant 0 : index
    %12 = vector.load %arg5[%c0_8, %c0_9] : memref<1x128xf32, #tpu.memory_space<vmem>>, vector<1x128xf32>
    %13 = vector.broadcast %12 : vector<1x128xf32> to vector<128x128xf32>
    %14 = arith.addf %11, %13 : vector<128x128xf32>
    %c0_10 = arith.constant 0 : index
    %c0_11 = arith.constant 0 : index
    %15 = vector.load %arg6[%c0_10, %c0_11] : memref<128x128xf32, #tpu.memory_space<vmem>>, vector<128x128xf32>
    tpu.vector_store %arg6[%c0_10, %c0_11], %14 {strides = array<i32>} : memref<128x128xf32, #tpu.memory_space<vmem>>, vector<128x128xf32>,
    %cst_12 = arith.constant dense<0.000000e+00> : vector<128xf32>
    %16 = vector.multi_reduction <add>, %14, %cst_12 [0] : vector<128x128xf32> to vector<128xf32>
    %17 = vector.shape_cast %16 : vector<128xf32> to vector<1x128xf32>
    %18 = arith.mulf %14, %14 : vector<128x128xf32>
    %cst_13 = arith.constant dense<0.000000e+00> : vector<128xf32>
    %19 = vector.multi_reduction <add>, %18, %cst_13 [0] : vector<128x128xf32> to vector<128xf32>
    %20 = vector.shape_cast %19 : vector<128xf32> to vector<1x128xf32>
    %21 = tpu.concatenate %17, %20 in 0 : vector<1x128xf32>, vector<1x128xf32> -> vector<2x128xf32>
    %22 = vector.shape_cast %21 : vector<2x128xf32> to vector<1x2x128xf32>
    %c0_14 = arith.constant 0 : index
    %c0_15 = arith.constant 0 : index
    %c0_16 = arith.constant 0 : index
    %23 = vector.load %arg7[%c0_14, %c0_15, %c0_16] : memref<1x2x128xf32, #tpu.memory_space<vmem>>, vector<1x2x128xf32>
    tpu.vector_store %arg7[%c0_14, %c0_15, %c0_16], %22 {strides = array<i32>} : memref<1x2x128xf32, #tpu.memory_space<vmem>>, vector<1x2x128xf32>,
    return
  }
  func.func @transform_0(%arg0: i32) -> (i32, i32) {
    %c0_i32 = arith.constant 0 : i32
    %c0_i32_0 = arith.constant 0 : i32
    return %arg0, %c0_i32 : i32, i32
  }
  func.func @transform_1(%arg0: i32) -> (i32, i32) {
    %c0_i32 = arith.constant 0 : i32
    %c0_i32_0 = arith.constant 0 : i32
    %c0_i32_1 = arith.constant 0 : i32
    return %c0_i32, %c0_i32_0 : i32, i32
  }
  func.func @transform_2(%arg0: i32) -> (i32, i32) {
    %c0_i32 = arith.constant 0 : i32
    %c0_i32_0 = arith.constant 0 : i32
    %c0_i32_1 = arith.constant 0 : i32
    return %c0_i32, %c0_i32_0 : i32, i32
  }
  func.func @transform_3(%arg0: i32) -> (i32, i32) {
    %c0_i32 = arith.constant 0 : i32
    %c0_i32_0 = arith.constant 0 : i32
    %c0_i32_1 = arith.constant 0 : i32
    return %c0_i32, %c0_i32_0 : i32, i32
  }
  func.func @transform_4(%arg0: i32) -> (i32, i32) {
    %c0_i32 = arith.constant 0 : i32
    %c0_i32_0 = arith.constant 0 : i32
    %c0_i32_1 = arith.constant 0 : i32
    return %c0_i32, %c0_i32_0 : i32, i32
  }
  func.func @transform_5(%arg0: i32) -> (i32, i32) {
    %c0_i32 = arith.constant 0 : i32
    %c0_i32_0 = arith.constant 0 : i32
    return %arg0, %c0_i32 : i32, i32
  }
  func.func @transform_6(%arg0: i32) -> (i32, i32, i32) {
    %c0_i32 = arith.constant 0 : i32
    %c0_i32_0 = arith.constant 0 : i32
    %c0_i32_1 = arith.constant 0 : i32
    return %arg0, %c0_i32, %c0_i32_0 : i32, i32, i32
  }
}

module attributes {stable_mosaic.version = 11 : i64} {
  func.func @_stage3_map_kernel(%arg0: i32, %arg1: memref<128x128xf32, #tpu.memory_space<vmem>>, %arg2: memref<128x128xf32, #tpu.memory_space<vmem>>, %arg3: memref<1x128xf32, #tpu.memory_space<vmem>>, %arg4: memref<1x128xf32, #tpu.memory_space<vmem>>, %arg5: memref<128x128xbf16, #tpu.memory_space<vmem>>, %arg6: memref<1x128xf32, #tpu.memory_space<vmem>>, %arg7: memref<128x128xf32, #tpu.memory_space<vmem>>, %arg8: memref<1x2x128xf32, #tpu.memory_space<vmem>>) attributes {dimension_semantics = [#tpu.dimension_semantics<parallel>], iteration_bounds = array<i64: 2>, scalar_prefetch = 0 : i64, scratch_operands = 0 : i64, tpu.core_type = #tpu.core_type<tc>, window_params = [{transform_indices = @transform_0, window_bounds = array<i64: 128, 128>}, {transform_indices = @transform_1, window_bounds = array<i64: 128, 128>}, {pipeline_mode = #tpu.pipeline_mode<synchronous>, transform_indices = @transform_2, window_bounds = array<i64: 1, 128>}, {pipeline_mode = #tpu.pipeline_mode<synchronous>, transform_indices = @transform_3, window_bounds = array<i64: 1, 128>}, {pipeline_mode = #tpu.pipeline_mode<synchronous>, transform_indices = @transform_4, window_bounds = array<i64: 128, 128>}, {pipeline_mode = #tpu.pipeline_mode<synchronous>, transform_indices = @transform_5, window_bounds = array<i64: 1, 128>}, {transform_indices = @transform_6, window_bounds = array<i64: 128, 128>}, {transform_indices = @transform_7, window_bounds = array<i64: 1, 2, 128>}]} {
    %c0 = arith.constant 0 : index
    %c0_0 = arith.constant 0 : index
    %0 = vector.load %arg1[%c0, %c0_0] : memref<128x128xf32, #tpu.memory_space<vmem>>, vector<128x128xf32>
    %c0_1 = arith.constant 0 : index
    %c0_2 = arith.constant 0 : index
    %1 = vector.load %arg3[%c0_1, %c0_2] : memref<1x128xf32, #tpu.memory_space<vmem>>, vector<1x128xf32>
    %2 = vector.broadcast %1 : vector<1x128xf32> to vector<128x128xf32>
    %3 = arith.mulf %0, %2 : vector<128x128xf32>
    %c0_3 = arith.constant 0 : index
    %c0_4 = arith.constant 0 : index
    %4 = vector.load %arg4[%c0_3, %c0_4] : memref<1x128xf32, #tpu.memory_space<vmem>>, vector<1x128xf32>
    %5 = vector.broadcast %4 : vector<1x128xf32> to vector<128x128xf32>
    %6 = arith.addf %3, %5 : vector<128x128xf32>
    %c0_5 = arith.constant 0 : index
    %c0_6 = arith.constant 0 : index
    %7 = vector.load %arg2[%c0_5, %c0_6] : memref<128x128xf32, #tpu.memory_space<vmem>>, vector<128x128xf32>
    %8 = arith.truncf %7 : vector<128x128xf32> to vector<128x128xbf16>
    %c0_7 = arith.constant 0 : index
    %c0_8 = arith.constant 0 : index
    %9 = vector.load %arg5[%c0_7, %c0_8] : memref<128x128xbf16, #tpu.memory_space<vmem>>, vector<128x128xbf16>
    %cst = arith.constant dense<0.000000e+00> : vector<128x128xf32>
    %10 = tpu.matmul %8, %9, %cst {dimension_numbers = #tpu.dot_dimension_numbers<[1], [0], [0], [1], [0, 0, 1, 1], [], []>} : vector<128x128xbf16>, vector<128x128xbf16>, vector<128x128xf32> -> vector<128x128xf32>
    %c0_9 = arith.constant 0 : index
    %c0_10 = arith.constant 0 : index
    %11 = vector.load %arg6[%c0_9, %c0_10] : memref<1x128xf32, #tpu.memory_space<vmem>>, vector<1x128xf32>
    %12 = vector.broadcast %11 : vector<1x128xf32> to vector<128x128xf32>
    %13 = arith.addf %10, %12 : vector<128x128xf32>
    %14 = arith.addf %13, %6 : vector<128x128xf32>
    %c0_11 = arith.constant 0 : index
    %c0_12 = arith.constant 0 : index
    %15 = vector.load %arg7[%c0_11, %c0_12] : memref<128x128xf32, #tpu.memory_space<vmem>>, vector<128x128xf32>
    tpu.vector_store %arg7[%c0_11, %c0_12], %14 {strides = array<i32>} : memref<128x128xf32, #tpu.memory_space<vmem>>, vector<128x128xf32>,
    %cst_13 = arith.constant dense<0.000000e+00> : vector<128xf32>
    %16 = vector.multi_reduction <add>, %14, %cst_13 [0] : vector<128x128xf32> to vector<128xf32>
    %17 = vector.shape_cast %16 : vector<128xf32> to vector<1x128xf32>
    %18 = arith.mulf %14, %14 : vector<128x128xf32>
    %cst_14 = arith.constant dense<0.000000e+00> : vector<128xf32>
    %19 = vector.multi_reduction <add>, %18, %cst_14 [0] : vector<128x128xf32> to vector<128xf32>
    %20 = vector.shape_cast %19 : vector<128xf32> to vector<1x128xf32>
    %21 = tpu.concatenate %17, %20 in 0 : vector<1x128xf32>, vector<1x128xf32> -> vector<2x128xf32>
    %22 = vector.shape_cast %21 : vector<2x128xf32> to vector<1x2x128xf32>
    %c0_15 = arith.constant 0 : index
    %c0_16 = arith.constant 0 : index
    %c0_17 = arith.constant 0 : index
    %23 = vector.load %arg8[%c0_15, %c0_16, %c0_17] : memref<1x2x128xf32, #tpu.memory_space<vmem>>, vector<1x2x128xf32>
    tpu.vector_store %arg8[%c0_15, %c0_16, %c0_17], %22 {strides = array<i32>} : memref<1x2x128xf32, #tpu.memory_space<vmem>>, vector<1x2x128xf32>,
    return
  }
  func.func @transform_0(%arg0: i32) -> (i32, i32) {
    %c0_i32 = arith.constant 0 : i32
    %c0_i32_0 = arith.constant 0 : i32
    return %arg0, %c0_i32 : i32, i32
  }
  func.func @transform_1(%arg0: i32) -> (i32, i32) {
    %c0_i32 = arith.constant 0 : i32
    %c0_i32_0 = arith.constant 0 : i32
    return %arg0, %c0_i32 : i32, i32
  }
  func.func @transform_2(%arg0: i32) -> (i32, i32) {
    %c0_i32 = arith.constant 0 : i32
    %c0_i32_0 = arith.constant 0 : i32
    %c0_i32_1 = arith.constant 0 : i32
    return %c0_i32, %c0_i32_0 : i32, i32
  }
  func.func @transform_3(%arg0: i32) -> (i32, i32) {
    %c0_i32 = arith.constant 0 : i32
    %c0_i32_0 = arith.constant 0 : i32
    %c0_i32_1 = arith.constant 0 : i32
    return %c0_i32, %c0_i32_0 : i32, i32
  }
  func.func @transform_4(%arg0: i32) -> (i32, i32) {
    %c0_i32 = arith.constant 0 : i32
    %c0_i32_0 = arith.constant 0 : i32
    %c0_i32_1 = arith.constant 0 : i32
    return %c0_i32, %c0_i32_0 : i32, i32
  }
  func.func @transform_5(%arg0: i32) -> (i32, i32) {
    %c0_i32 = arith.constant 0 : i32
    %c0_i32_0 = arith.constant 0 : i32
    %c0_i32_1 = arith.constant 0 : i32
    return %c0_i32, %c0_i32_0 : i32, i32
  }
  func.func @transform_6(%arg0: i32) -> (i32, i32) {
    %c0_i32 = arith.constant 0 : i32
    %c0_i32_0 = arith.constant 0 : i32
    return %arg0, %c0_i32 : i32, i32
  }
  func.func @transform_7(%arg0: i32) -> (i32, i32, i32) {
    %c0_i32 = arith.constant 0 : i32
    %c0_i32_0 = arith.constant 0 : i32
    %c0_i32_1 = arith.constant 0 : i32
    return %arg0, %c0_i32, %c0_i32_0 : i32, i32, i32
  }
}

module attributes {stable_mosaic.version = 11 : i64} {
  func.func @_stage4_kernel(%arg0: i32, %arg1: memref<128x128xf32, #tpu.memory_space<vmem>>, %arg2: memref<1x128xf32, #tpu.memory_space<vmem>>, %arg3: memref<1x128xf32, #tpu.memory_space<vmem>>, %arg4: memref<128x128xf32, #tpu.memory_space<vmem>>) attributes {dimension_semantics = [#tpu.dimension_semantics<parallel>], iteration_bounds = array<i64: 2>, scalar_prefetch = 0 : i64, scratch_operands = 0 : i64, tpu.core_type = #tpu.core_type<tc>, window_params = [{transform_indices = @transform_0, window_bounds = array<i64: 128, 128>}, {pipeline_mode = #tpu.pipeline_mode<synchronous>, transform_indices = @transform_1, window_bounds = array<i64: 1, 128>}, {pipeline_mode = #tpu.pipeline_mode<synchronous>, transform_indices = @transform_2, window_bounds = array<i64: 1, 128>}, {transform_indices = @transform_3, window_bounds = array<i64: 128, 128>}]} {
    %c0 = arith.constant 0 : index
    %c0_0 = arith.constant 0 : index
    %0 = vector.load %arg1[%c0, %c0_0] : memref<128x128xf32, #tpu.memory_space<vmem>>, vector<128x128xf32>
    %c0_1 = arith.constant 0 : index
    %c0_2 = arith.constant 0 : index
    %1 = vector.load %arg2[%c0_1, %c0_2] : memref<1x128xf32, #tpu.memory_space<vmem>>, vector<1x128xf32>
    %2 = vector.broadcast %1 : vector<1x128xf32> to vector<128x128xf32>
    %3 = arith.mulf %0, %2 : vector<128x128xf32>
    %c0_3 = arith.constant 0 : index
    %c0_4 = arith.constant 0 : index
    %4 = vector.load %arg3[%c0_3, %c0_4] : memref<1x128xf32, #tpu.memory_space<vmem>>, vector<1x128xf32>
    %5 = vector.broadcast %4 : vector<1x128xf32> to vector<128x128xf32>
    %6 = arith.addf %3, %5 : vector<128x128xf32>
    %cst = arith.constant 0.000000e+00 : f32
    %7 = vector.broadcast %cst : f32 to vector<128x128xf32>
    %8 = arith.maximumf %6, %7 : vector<128x128xf32>
    %c0_5 = arith.constant 0 : index
    %c0_6 = arith.constant 0 : index
    %9 = vector.load %arg4[%c0_5, %c0_6] : memref<128x128xf32, #tpu.memory_space<vmem>>, vector<128x128xf32>
    tpu.vector_store %arg4[%c0_5, %c0_6], %8 {strides = array<i32>} : memref<128x128xf32, #tpu.memory_space<vmem>>, vector<128x128xf32>,
    return
  }
  func.func @transform_0(%arg0: i32) -> (i32, i32) {
    %c0_i32 = arith.constant 0 : i32
    %c0_i32_0 = arith.constant 0 : i32
    return %arg0, %c0_i32 : i32, i32
  }
  func.func @transform_1(%arg0: i32) -> (i32, i32) {
    %c0_i32 = arith.constant 0 : i32
    %c0_i32_0 = arith.constant 0 : i32
    %c0_i32_1 = arith.constant 0 : i32
    return %c0_i32, %c0_i32_0 : i32, i32
  }
  func.func @transform_2(%arg0: i32) -> (i32, i32) {
    %c0_i32 = arith.constant 0 : i32
    %c0_i32_0 = arith.constant 0 : i32
    %c0_i32_1 = arith.constant 0 : i32
    return %c0_i32, %c0_i32_0 : i32, i32
  }
  func.func @transform_3(%arg0: i32) -> (i32, i32) {
    %c0_i32 = arith.constant 0 : i32
    %c0_i32_0 = arith.constant 0 : i32
    return %arg0, %c0_i32 : i32, i32
  }
}

</mosaic_0001>

<bundles_post_ra>
// kernel: _lambda_.4
= control target key start
LH: loop header
LB: loop body
LE: loop exit
PB: predicated region body
PF: predicated region fallthrough
CT: control target
= control target key end

     0   :  { %s703_s15 = smov 0   ;;  %s810_s0 = inlined_call_operand.vmem [shape: f32[256,128], index: 0, kind: input, shape index: {}]   ;;  %s811_s1 = inlined_call_operand.vmem [shape: bf16[128,128], index: 1, kind: input, shape index: {}]   ;;  %s812_s2 = inlined_call_operand.vmem [shape: f32[1,128], index: 2, kind: input, shape index: {}]   ;;  %s813_s3 = inlined_call_operand.vmem [shape: f32[256,128], index: 3, kind: output, shape index: {0}]   ;;  %s814_s4 = inlined_call_operand.vmem [shape: f32[2,2,128], index: 4, kind: output, shape index: {1}]  }
   0x1 LB: > { %s709_s16 = sadd.s32 4294967295, %s676_s15   ;;  %p573_p0 = scmp.ge.s32.totalorder %s676_s15, 1  ;;  %s676_s15 = sphi %s703_s15, %s15_s15  }
   0x2   : > { %p166_p1 = scmp.lt.s32.totalorder %s676_s15, 3 }
   0x4   : > { %p167_p2 = pnand %p573_p0, %p166_p1 }
   0x5   : > { %v662_v0 = vld [vmem:[%s811_s1] sm:$0xff] (!%p167_p2)   ;;  %s574_s19 = sshll.u32 (!%p167_p2), %s709_s16, 4  ;;  %v663_v1 = vld [vmem:[%s811_s1 + $0x8] sm:$0xff] (!%p167_p2)   ;;  %v664_v2 = vld [vmem:[%s811_s1 + $0x10] sm:$0xff] (!%p167_p2)   ;;  %p208_p4 = scmp.lt.s32.totalorder (!%p167_p2), %s709_s16, 1  ;;  %vm479_vm0 = vcmask (!%p167_p2), 1040384  }
   0x6   : > { %170 = sbr.rel (%p167_p2) target bundleno = 302 (0x12e), region = 32  ;;  %p197_p3 = scmp.lt.s32.totalorder (!%p167_p2), %s574_s19, 31  ;;  %606 = vmatprep.subr.bf16.mxu0 (!%p167_p2), %v662_v0  ;;  %638 = vmatprep.subr.bf16.mxu1 (!%p167_p2), %v662_v0  ;;  %v665_v3 = vld [vmem:[%s811_s1 + $0x18] sm:$0xff] (!%p167_p2)   ;;  %v666_v9 = vld [vmem:[%s811_s1 + $0x20] sm:$0xff] (!%p167_p2)   ;;  %v667_v11 = vld [vmem:[%s811_s1 + $0x28] sm:$0xff] (!%p167_p2)  }
   0x7   : > { %607 = vmatpush3.bf16.msra.mxu0 (!%p167_p2), %v662_v0  ;;  %646 = vmatpush3.bf16.msra.mxu1 (!%p167_p2), %v662_v0  ;;  %v668_v12 = vld [vmem:[%s811_s1 + $0x30] sm:$0xff] (!%p167_p2)   ;;  %v669_v13 = vld [vmem:[%s811_s1 + $0x38] sm:$0xff] (!%p167_p2)   ;;  %v579_v32 = vld [vmem:[%s812_s2] ss:$0 sm:$0xff] (!%p167_p2) }
   0x8   : > { %608 = vmatprep.subr.bf16.mxu0 (!%p167_p2), %v663_v1  ;;  %639 = vmatprep.subr.bf16.mxu1 (!%p167_p2), %v663_v1 }
   0xb   : > { %609 = vmatpush3.bf16.msra.mxu0 (!%p167_p2), %v663_v1  ;;  %647 = vmatpush3.bf16.msra.mxu1 (!%p167_p2), %v663_v1 }
   0xc   : > { %610 = vmatprep.subr.bf16.mxu0 (!%p167_p2), %v664_v2  ;;  %640 = vmatprep.subr.bf16.mxu1 (!%p167_p2), %v664_v2 }
   0xd   : > { %s816_s19 = smov (!%p197_p3, %s574_s19), 31  ;;  %s818_s16 = smov (!%p208_p4, %s709_s16), 1 }
   0xe   : > { %s575_s24 = sshll.u32 %s816_s19, 3  ;;  %s578_s19 = sshll.u32 %s818_s16, 1 }
   0xf   : > { %s731_s27 = scalar_lea.vmem %s810_s0, %s575_s24  ;;  %611 = vmatpush3.bf16.msra.mxu0 %v664_v2  ;;  %648 = vmatpush3.bf16.msra.mxu1 %v664_v2  ;;  %s772_s18 = scalar_lea.vmem %s813_s3, %s575_s24 }
  0x10   : > { %v213_v4 = vld [vmem:[%s731_s27] sm:$0xff]  ;;  %v214_v5 = vld [vmem:[%s731_s27 + $0x8] sm:$0xff]  ;;  %612 = vmatprep.subr.bf16.mxu0 %v665_v3  ;;  %641 = vmatprep.subr.bf16.mxu1 %v665_v3  ;;  %v215_v14 = vld [vmem:[%s731_s27 + $0x10] sm:$0xff]  ;;  %s211_s22 = scalar_lea.vmem %s814_s4, %s578_s19 }
  0x11   : > { %v229_v6 = vpack.c.bf16 %v214_v5, %v213_v4  ;;  %v221_v7 = vld [vmem:[%s731_s27 + $0x40] sm:$0xff]  ;;  %v222_v8 = vld [vmem:[%s731_s27 + $0x48] sm:$0xff]  ;;  %v216_v15 = vld [vmem:[%s731_s27 + $0x18] sm:$0xff] }
  0x12   : > { %v233_v10 = vpack.c.bf16 %v222_v8, %v221_v7  ;;  %v217_v16 = vld [vmem:[%s731_s27 + $0x20] sm:$0xff]  ;;  %v223_v17 = vld [vmem:[%s731_s27 + $0x50] sm:$0xff]  ;;  %v224_v18 = vld [vmem:[%s731_s27 + $0x58] sm:$0xff]  ;;  %v230_v22 = vpack.c.bf16 %v216_v15, %v215_v14 }
  0x13   : > { %622 = vmatprep.mubr.bf16.mxu0 %v229_v6  ;;  %613 = vmatpush3.bf16.msra.mxu0 %v665_v3  ;;  %v218_v19 = vld [vmem:[%s731_s27 + $0x28] sm:$0xff]  ;;  %v225_v20 = vld [vmem:[%s731_s27 + $0x60] sm:$0xff]  ;;  %v234_v23 = vpack.c.bf16 %v224_v18, %v223_v17  ;;  %v219_v26 = vld [vmem:[%s731_s27 + $0x30] sm:$0xff] }
  0x14   : > { %630 = vmatprep.mubr.bf16.mxu1 %v233_v10  ;;  %649 = vmatpush3.bf16.msra.mxu1 %v665_v3  ;;  %v226_v21 = vld [vmem:[%s731_s27 + $0x68] sm:$0xff]  ;;  %v231_v24 = vpack.c.bf16 %v218_v19, %v217_v16  ;;  %v220_v27 = vld [vmem:[%s731_s27 + $0x38] sm:$0xff]  ;;  %v227_v28 = vld [vmem:[%s731_s27 + $0x70] sm:$0xff] }
  0x15   : > { %614 = vmatprep.subr.bf16.mxu0 %v666_v9  ;;  %642 = vmatprep.subr.bf16.mxu1 %v666_v9  ;;  %v235_v25 = vpack.c.bf16 %v226_v21, %v225_v20  ;;  %v228_v29 = vld [vmem:[%s731_s27 + $0x78] sm:$0xff]  ;;  %v232_v30 = vpack.c.bf16 %v220_v27, %v219_v26 }
  0x16   : > { %v236_v31 = vpack.c.bf16 %v228_v29, %v227_v28 }
  0x17   : > { %615 = vmatpush3.bf16.msra.mxu0 %v666_v9 }
  0x18   : > { %650 = vmatpush3.bf16.msra.mxu1 %v666_v9  ;;  %616 = vmatprep.subr.bf16.mxu0 %v667_v11 }
  0x19   : > { %643 = vmatprep.subr.bf16.mxu1 %v667_v11 }
  0x1b   : > { %617 = vmatpush3.bf16.msra.mxu0 %v667_v11 }
  0x1c   : > { %651 = vmatpush3.bf16.msra.mxu1 %v667_v11  ;;  %618 = vmatprep.subr.bf16.mxu0 %v668_v12 }
  0x1d   : > { %644 = vmatprep.subr.bf16.mxu1 %v668_v12 }
  0x1f   : > { %619 = vmatpush3.bf16.msra.mxu0 %v668_v12 }
  0x20   : > { %652 = vmatpush3.bf16.msra.mxu1 %v668_v12  ;;  %620 = vmatprep.subr.bf16.mxu0 %v669_v13 }
  0x21   : > { %645 = vmatprep.subr.bf16.mxu1 %v669_v13 }
  0x23   : > { %621 = vmatpush3.bf16.msra.mxu0 %v669_v13 }
  0x24   : > { %653 = vmatpush3.bf16.msra.mxu1 %v669_v13 }
  0x26   : > { %623 = vmatmul.mubr.bf16.vlgmr.msra.gmra.mrb[0].mxu0 %v230_v22 }
  0x27   : > { %631 = vmatmul.mubr.bf16.vlgmr.msra.gmra.mrb[0].mxu1 %v234_v23  ;;  %626 = vmatprep.mubr.bf16.mxu0 %v231_v24 }
  0x28   : > { %634 = vmatprep.mubr.bf16.mxu1 %v235_v25 }
  0x2e   : > { %627 = vmatmul.mubr.bf16.gmra.mrb[4].mxu0 %v232_v30 }
  0x2f   : > { %635 = vmatmul.mubr.bf16.gmra.mrb[4].mxu1 %v236_v31 }
  0xf9   : > { %v624_v33 = vpop.f32.mrb[0].mxu0 }
  0xfa   : > { %v632_v34 = vpop.f32.mrb[0].mxu1  ;;  %v351_v35 = vadd.f32 %v624_v33, %v579_v32  ;;  %v342_v36 = vpop.f32.mrb[1].mxu0 }
  0xfb   : > { %v774_v37 = vadd.f32 %v632_v34, %v579_v32  ;;  %v374_v38 = vpop.f32.mrb[1].mxu1  ;;  %v343_v39 = vadd.f32 %v579_v32, %v342_v36  ;;  %v625_v40 = vpop.f32.mrb[2].mxu0 }
  0xfc   : > { %v375_v41 = vadd.f32 %v579_v32, %v374_v38  ;;  %v633_v42 = vpop.f32.mrb[2].mxu1  ;;  %407 = vst [vmem:[%s772_s18 + $0x10] sm:$0xff] %v351_v35  ;;  %v354_v43 = vadd.f32 %v625_v40, %v579_v32  ;;  %v345_v44 = vpop.f32.mrb[3].mxu0  ;;  %v444_v52 = vmul.f32 %v351_v35, %v351_v35 }
  0xfd   : > { %415 = vst [vmem:[%s772_s18 + $0x50] sm:$0xff] %v774_v37  ;;  %v779_v45 = vadd.f32 %v633_v42, %v579_v32  ;;  %v377_v46 = vpop.f32.mrb[3].mxu1  ;;  %405 = vst [vmem:[%s772_s18] sm:$0xff] %v343_v39  ;;  %v346_v47 = vadd.f32 %v579_v32, %v345_v44  ;;  %v442_v49 = vmul.f32 %v343_v39, %v343_v39 }
  0xfe   : > { %413 = vst [vmem:[%s772_s18 + $0x40] sm:$0xff] %v375_v41  ;;  %v378_v48 = vadd.f32 %v579_v32, %v377_v46  ;;  %408 = vst [vmem:[%s772_s18 + $0x18] sm:$0xff] %v354_v43  ;;  %v445_v57 = vmul.f32 %v354_v43, %v354_v43  ;;  %v450_v22 = vmul.f32 %v375_v41, %v375_v41 }
  0xff   : > { %416 = vst [vmem:[%s772_s18 + $0x58] sm:$0xff] %v779_v45  ;;  %406 = vst [vmem:[%s772_s18 + $0x8] sm:$0xff] %v346_v47  ;;  %v421_v50 = vadd.f32 %v346_v47, %v343_v39  ;;  %v443_v51 = vmul.f32 %v346_v47, %v346_v47  ;;  %v452_v28 = vmul.f32 %v774_v37, %v774_v37 }
 0x100   : > { %414 = vst [vmem:[%s772_s18 + $0x48] sm:$0xff] %v378_v48  ;;  %v451_v27 = vmul.f32 %v378_v48, %v378_v48  ;;  %v453_v31 = vmul.f32 %v779_v45, %v779_v45 }
 0x101   : > { %v422_v53 = vadd.f32 %v421_v50, %v351_v35  ;;  %v458_v54 = vadd.f32 %v443_v51, %v442_v49  ;;  %v628_v55 = vpop.f32.mrb[4].mxu0 }
 0x102   : > { %v636_v56 = vpop.f32.mrb[4].mxu1  ;;  %v367_v58 = vadd.f32 %v628_v55, %v579_v32  ;;  %v358_v59 = vpop.f32.mrb[5].mxu0 }
 0x103   : > { %v399_v60 = vadd.f32 %v636_v56, %v579_v32  ;;  %v390_v61 = vpop.f32.mrb[5].mxu1  ;;  %v459_v62 = vadd.f32 %v458_v54, %v444_v52  ;;  %v359_v63 = vadd.f32 %v579_v32, %v358_v59  ;;  %v423_v0 = vadd.f32 %v422_v53, %v354_v43  ;;  %v629_v1 = vpop.f32.mrb[6].mxu0 }
 0x104   : > { %v391_v2 = vadd.f32 %v579_v32, %v390_v61  ;;  %v637_v3 = vpop.f32.mrb[6].mxu1  ;;  %411 = vst [vmem:[%s772_s18 + $0x30] sm:$0xff] %v367_v58  ;;  %v370_v4 = vadd.f32 %v629_v1, %v579_v32  ;;  %v361_v5 = vpop.f32.mrb[7].mxu0  ;;  %v448_v16 = vmul.f32 %v367_v58, %v367_v58 }
 0x105   : > { %419 = vst [vmem:[%s772_s18 + $0x70] sm:$0xff] %v399_v60  ;;  %v402_v6 = vadd.f32 %v637_v3, %v579_v32  ;;  %v393_v7 = vpop.f32.mrb[7].mxu1  ;;  %409 = vst [vmem:[%s772_s18 + $0x20] sm:$0xff] %v359_v63  ;;  %v424_v8 = vadd.f32 %v423_v0, %v359_v63  ;;  %v446_v9 = vmul.f32 %v359_v63, %v359_v63 }
 0x106   : > { %v460_v10 = vadd.f32 %v459_v62, %v445_v57  ;;  %v362_v11 = vadd.f32 %v579_v32, %v361_v5  ;;  %417 = vst [vmem:[%s772_s18 + $0x60] sm:$0xff] %v391_v2  ;;  %412 = vst [vmem:[%s772_s18 + $0x38] sm:$0xff] %v370_v4  ;;  %v394_v12 = vadd.f32 %v579_v32, %v393_v7 }
 0x107   : > { %420 = vst [vmem:[%s772_s18 + $0x78] sm:$0xff] %v402_v6  ;;  %v449_v19 = vmul.f32 %v370_v4, %v370_v4  ;;  %v454_v34 = vmul.f32 %v391_v2, %v391_v2  ;;  %v457_v44 = vmul.f32 %v402_v6, %v402_v6 }
 0x108   : > { %v461_v13 = vadd.f32 %v460_v10, %v446_v9  ;;  %410 = vst [vmem:[%s772_s18 + $0x28] sm:$0xff] %v362_v11  ;;  %v425_v14 = vadd.f32 %v424_v8, %v362_v11  ;;  %v447_v15 = vmul.f32 %v362_v11, %v362_v11  ;;  %418 = vst [vmem:[%s772_s18 + $0x68] sm:$0xff] %v394_v12 }
 0x109   : > { %v455_v40 = vmul.f32 %v394_v12, %v394_v12 }
 0x10a   : > { %v426_v17 = vadd.f32 %v425_v14, %v367_v58  ;;  %v462_v18 = vadd.f32 %v461_v13, %v447_v15 }
 0x10c   : > { %v463_v20 = vadd.f32 %v462_v18, %v448_v16  ;;  %v427_v21 = vadd.f32 %v426_v17, %v370_v4 }
 0x10e   : > { %v428_v23 = vadd.f32 %v427_v21, %v375_v41  ;;  %v464_v24 = vadd.f32 %v463_v20, %v449_v19  ;;  %v456_v41 = vmul.f32 %v399_v60, %v399_v60 }
 0x110   : > { %v465_v25 = vadd.f32 %v464_v24, %v450_v22  ;;  %v429_v26 = vadd.f32 %v428_v23, %v378_v48 }
 0x112   : > { %v430_v29 = vadd.f32 %v429_v26, %v774_v37  ;;  %v466_v30 = vadd.f32 %v465_v25, %v451_v27 }
 0x114   : > { %v467_v32 = vadd.f32 %v466_v30, %v452_v28  ;;  %v431_v33 = vadd.f32 %v430_v29, %v779_v45 }
 0x116   : > { %v432_v35 = vadd.f32 %v431_v33, %v391_v2  ;;  %v468_v36 = vadd.f32 %v467_v32, %v453_v31 }
 0x118   : > { %v469_v38 = vadd.f32 %v468_v36, %v454_v34  ;;  %v433_v39 = vadd.f32 %v432_v35, %v394_v12 }
 0x11a   : > { %v434_v42 = vadd.f32 %v433_v39, %v399_v60  ;;  %v470_v43 = vadd.f32 %v469_v38, %v455_v40 }
 0x11c   : > { %v435_v37 = vadd.f32 %v434_v42, %v402_v6  ;;  %v471_v46 = vadd.f32 %v470_v43, %v456_v41 }
 0x11e   : > { %v436_v47 = vrot.slane %v435_v37, 4  ;;  %v472_v48 = vadd.f32 %v471_v46, %v457_v44 }
 0x120   : > { %v437_v49 = vadd.f32 %v436_v47, %v435_v37  ;;  %v473_v50 = vrot.slane %v472_v48, 4 }
 0x122   : > { %v438_v51 = vrot.slane %v437_v49, 2  ;;  %v474_v45 = vadd.f32 %v473_v50, %v472_v48 }
 0x124   : > { %v439_v52 = vadd.f32 %v438_v51, %v437_v49  ;;  %v475_v53 = vrot.slane %v474_v45, 2 }
 0x126   : > { %v440_v54 = vrot.slane %v439_v52, 1  ;;  %v476_v55 = vadd.f32 %v475_v53, %v474_v45 }
 0x128   : > { %v477_v56 = vrot.slane %v476_v55, 1  ;;  %v441_v57 = vadd.f32 %v440_v54, %v439_v52 }
 0x12a   : > { %v478_v58 = vadd.f32 %v477_v56, %v476_v55 }
 0x12c   : > { %v480_v59 = vsel %vm479_vm0, %v441_v57, %v478_v58 }
 0x12d   : > { %481 = vst [vmem:[%s211_s22] sm:$0x3] %v480_v59 }
 0x12e PF: > { %s15_s15 = sadd.s32 1, %s676_s15  }
 0x12f   : > { %p12_p5 = scmp.ge.s32.totalorder %s15_s15, 4  }
 0x131   :  { %14 = sbr.rel (!%p12_p5) target bundleno = 1 (0x1), region = 74 }

// kernel: _lambda_.7
= control target key start
LH: loop header
LB: loop body
LE: loop exit
PB: predicated region body
PF: predicated region fallthrough
CT: control target
= control target key end

     0   :  { %s373_s12 = smov 0   ;;  %s468_s0 = inlined_call_operand.vmem [shape: f32[256,128], index: 0, kind: input, shape index: {}]   ;;  %s469_s1 = inlined_call_operand.vmem [shape: f32[1,128], index: 1, kind: input, shape index: {}]   ;;  %s470_s2 = inlined_call_operand.vmem [shape: f32[1,128], index: 2, kind: input, shape index: {}]   ;;  %s471_s3 = inlined_call_operand.vmem [shape: f32[256,128], index: 3, kind: output, shape index: {}]  }
   0x1 LB: > { %s324_s13 = sadd.s32 4294967295, %s351_s12   ;;  %p328_p0 = scmp.ge.s32.totalorder %s351_s12, 1  ;;  %s351_s12 = sphi %s373_s12, %s13_s12  }
   0x2   : > { %p138_p1 = scmp.lt.s32.totalorder %s351_s12, 3 }
   0x4   : > { %p139_p2 = pnand %p328_p0, %p138_p1 }
   0x5   : > { %s329_s14 = sshll.u32 (!%p139_p2), %s324_s13, 4  ;;  %v384_v0 = vld [vmem:[%s469_s1] ss:$0 sm:$0xff] (!%p139_p2) }
   0x6   : > { %142 = sbr.rel (%p139_p2) target bundleno = 34 (0x22), region = 32  ;;  %p163_p3 = scmp.lt.s32.totalorder (!%p139_p2), %s329_s14, 31  ;;  %v394_v1 = vld [vmem:[%s470_s2] ss:$0 sm:$0xff] (!%p139_p2) }
   0xd   : > { %s473_s14 = smov (!%p163_p3, %s329_s14), 31 }
   0xe   : > { %s330_s15 = sshll.u32 %s473_s14, 3 }
   0xf   : > { %s389_s20 = scalar_lea.vmem %s468_s0, %s330_s15  ;;  %s417_s25 = scalar_lea.vmem %s471_s3, %s330_s15 }
  0x10   : > { %v174_v2 = vld [vmem:[%s389_s20] sm:$0xff]  ;;  %v175_v3 = vld [vmem:[%s389_s20 + $0x8] sm:$0xff]  ;;  %v176_v4 = vld [vmem:[%s389_s20 + $0x10] sm:$0xff] }
  0x11   : > { %v197_v5 = vmul.f32 %v384_v0, %v174_v2  ;;  %v198_v6 = vmul.f32 %v384_v0, %v175_v3  ;;  %v199_v7 = vmul.f32 %v384_v0, %v176_v4  ;;  %v177_v8 = vld [vmem:[%s389_s20 + $0x18] sm:$0xff]  ;;  %v178_v9 = vld [vmem:[%s389_s20 + $0x20] sm:$0xff]  ;;  %v179_v10 = vld [vmem:[%s389_s20 + $0x28] sm:$0xff] }
  0x12   : > { %v200_v11 = vmul.f32 %v384_v0, %v177_v8  ;;  %v201_v12 = vmul.f32 %v384_v0, %v178_v9  ;;  %v202_v13 = vmul.f32 %v384_v0, %v179_v10  ;;  %v180_v14 = vld [vmem:[%s389_s20 + $0x30] sm:$0xff]  ;;  %v181_v15 = vld [vmem:[%s389_s20 + $0x38] sm:$0xff]  ;;  %v182_v24 = vld [vmem:[%s389_s20 + $0x40] sm:$0xff] }
  0x13   : > { %v220_v16 = vadd.f32 %v394_v1, %v197_v5  ;;  %v221_v17 = vadd.f32 %v394_v1, %v198_v6  ;;  %v222_v18 = vadd.f32 %v394_v1, %v199_v7  ;;  %v203_v19 = vmul.f32 %v384_v0, %v180_v14  ;;  %v183_v25 = vld [vmem:[%s389_s20 + $0x48] sm:$0xff]  ;;  %v184_v26 = vld [vmem:[%s389_s20 + $0x50] sm:$0xff]  ;;  %v185_v31 = vld [vmem:[%s389_s20 + $0x58] sm:$0xff] }
  0x14   : > { %v223_v20 = vadd.f32 %v394_v1, %v200_v11  ;;  %v224_v21 = vadd.f32 %v394_v1, %v201_v12  ;;  %v225_v22 = vadd.f32 %v394_v1, %v202_v13  ;;  %v204_v23 = vmul.f32 %v384_v0, %v181_v15  ;;  %v186_v32 = vld [vmem:[%s389_s20 + $0x60] sm:$0xff]  ;;  %v187_v33 = vld [vmem:[%s389_s20 + $0x68] sm:$0xff]  ;;  %v188_v38 = vld [vmem:[%s389_s20 + $0x70] sm:$0xff] }
  0x15   : > { %v236_v27 = vmax.f32 %v220_v16, 0.0  ;;  %v237_v28 = vmax.f32 %v221_v17, 0.0  ;;  %v238_v29 = vmax.f32 %v222_v18, 0.0  ;;  %v226_v30 = vadd.f32 %v394_v1, %v203_v19  ;;  %v189_v43 = vld [vmem:[%s389_s20 + $0x78] sm:$0xff] }
  0x16   : > { %v239_v34 = vmax.f32 %v223_v20, 0.0  ;;  %v240_v35 = vmax.f32 %v224_v21, 0.0  ;;  %v241_v36 = vmax.f32 %v225_v22, 0.0  ;;  %v227_v37 = vadd.f32 %v394_v1, %v204_v23 }
  0x17   : > { %252 = vst [vmem:[%s417_s25] sm:$0xff] %v236_v27  ;;  %253 = vst [vmem:[%s417_s25 + $0x8] sm:$0xff] %v237_v28  ;;  %v242_v39 = vmax.f32 %v226_v30, 0.0  ;;  %v205_v40 = vmul.f32 %v384_v0, %v182_v24  ;;  %v206_v41 = vmul.f32 %v384_v0, %v183_v25  ;;  %v207_v42 = vmul.f32 %v384_v0, %v184_v26 }
  0x18   : > { %254 = vst [vmem:[%s417_s25 + $0x10] sm:$0xff] %v238_v29  ;;  %255 = vst [vmem:[%s417_s25 + $0x18] sm:$0xff] %v239_v34  ;;  %v243_v44 = vmax.f32 %v227_v37, 0.0  ;;  %v208_v45 = vmul.f32 %v384_v0, %v185_v31  ;;  %v209_v46 = vmul.f32 %v384_v0, %v186_v32  ;;  %v210_v47 = vmul.f32 %v384_v0, %v187_v33 }
  0x19   : > { %256 = vst [vmem:[%s417_s25 + $0x20] sm:$0xff] %v240_v35  ;;  %257 = vst [vmem:[%s417_s25 + $0x28] sm:$0xff] %v241_v36  ;;  %v228_v48 = vadd.f32 %v394_v1, %v205_v40  ;;  %v229_v49 = vadd.f32 %v394_v1, %v206_v41  ;;  %v230_v50 = vadd.f32 %v394_v1, %v207_v42 }
  0x1a   : > { %258 = vst [vmem:[%s417_s25 + $0x30] sm:$0xff] %v242_v39  ;;  %v211_v51 = vmul.f32 %v384_v0, %v188_v38  ;;  %259 = vst [vmem:[%s417_s25 + $0x38] sm:$0xff] %v243_v44  ;;  %v231_v52 = vadd.f32 %v394_v1, %v208_v45  ;;  %v232_v53 = vadd.f32 %v394_v1, %v209_v46 }
  0x1b   : > { %v233_v54 = vadd.f32 %v394_v1, %v210_v47  ;;  %v212_v55 = vmul.f32 %v384_v0, %v189_v43  ;;  %v244_v56 = vmax.f32 %v228_v48, 0.0  ;;  %v245_v57 = vmax.f32 %v229_v49, 0.0 }
  0x1c   : > { %v246_v58 = vmax.f32 %v230_v50, 0.0  ;;  %v234_v59 = vadd.f32 %v394_v1, %v211_v51  ;;  %v247_v60 = vmax.f32 %v231_v52, 0.0  ;;  %v248_v61 = vmax.f32 %v232_v53, 0.0 }
  0x1d   : > { %v249_v62 = vmax.f32 %v233_v54, 0.0  ;;  %v235_v63 = vadd.f32 %v394_v1, %v212_v55  ;;  %260 = vst [vmem:[%s417_s25 + $0x40] sm:$0xff] %v244_v56  ;;  %261 = vst [vmem:[%s417_s25 + $0x48] sm:$0xff] %v245_v57 }
  0x1e   : > { %262 = vst [vmem:[%s417_s25 + $0x50] sm:$0xff] %v246_v58  ;;  %v250_v2 = vmax.f32 %v234_v59, 0.0  ;;  %263 = vst [vmem:[%s417_s25 + $0x58] sm:$0xff] %v247_v60 }
  0x1f   : > { %264 = vst [vmem:[%s417_s25 + $0x60] sm:$0xff] %v248_v61  ;;  %265 = vst [vmem:[%s417_s25 + $0x68] sm:$0xff] %v249_v62  ;;  %v251_v0 = vmax.f32 %v235_v63, 0.0 }
  0x20   : > { %266 = vst [vmem:[%s417_s25 + $0x70] sm:$0xff] %v250_v2 }
  0x21   : > { %267 = vst [vmem:[%s417_s25 + $0x78] sm:$0xff] %v251_v0 }
  0x22 PF: > { %s13_s12 = sadd.s32 1, %s351_s12  }
  0x23   : > { %p10_p4 = scmp.ge.s32.totalorder %s13_s12, 4  }
  0x25   :  { %12 = sbr.rel (!%p10_p4) target bundleno = 1 (0x1), region = 62 }

// kernel: _lambda_.5
= control target key start
LH: loop header
LB: loop body
LE: loop exit
PB: predicated region body
PF: predicated region fallthrough
CT: control target
= control target key end

     0   :  { %s831_s21 = smov 0   ;;  %s980_s0 = inlined_call_operand.vmem [shape: f32[256,128], index: 0, kind: input, shape index: {}]   ;;  %s981_s1 = inlined_call_operand.vmem [shape: f32[1,128], index: 1, kind: input, shape index: {}]   ;;  %s982_s2 = inlined_call_operand.vmem [shape: f32[1,128], index: 2, kind: input, shape index: {}]   ;;  %s983_s3 = inlined_call_operand.vmem [shape: bf16[128,128], index: 3, kind: input, shape index: {}]   ;;  %s984_s4 = inlined_call_operand.vmem [shape: f32[1,128], index: 4, kind: input, shape index: {}]   ;;  %s985_s5 = inlined_call_operand.vmem [shape: f32[256,128], index: 5, kind: output, shape index: {0}]   ;;  %s986_s6 = inlined_call_operand.vmem [shape: f32[2,2,128], index: 6, kind: output, shape index: {1}]  }
   0x1 LB: > { %s837_s22 = sadd.s32 4294967295, %s794_s21   ;;  %p689_p0 = scmp.ge.s32.totalorder %s794_s21, 1  ;;  %s794_s21 = sphi %s831_s21, %s17_s21  }
   0x2   : > { %p216_p1 = scmp.lt.s32.totalorder %s794_s21, 3 }
   0x4   : > { %p217_p2 = pnand %p689_p0, %p216_p1 }
   0x5   : > { %v780_v0 = vld [vmem:[%s983_s3] sm:$0xff] (!%p217_p2)   ;;  %s690_s25 = sshll.u32 (!%p217_p2), %s837_s22, 4  ;;  %v781_v1 = vld [vmem:[%s983_s3 + $0x8] sm:$0xff] (!%p217_p2)   ;;  %v782_v2 = vld [vmem:[%s983_s3 + $0x10] sm:$0xff] (!%p217_p2)   ;;  %p262_p4 = scmp.lt.s32.totalorder (!%p217_p2), %s837_s22, 1  ;;  %vm595_vm0 = vcmask (!%p217_p2), 1040384  }
   0x6   : > { %220 = sbr.rel (%p217_p2) target bundleno = 301 (0x12d), region = 40  ;;  %p251_p3 = scmp.lt.s32.totalorder (!%p217_p2), %s690_s25, 31  ;;  %724 = vmatprep.subr.bf16.mxu0 (!%p217_p2), %v780_v0  ;;  %756 = vmatprep.subr.bf16.mxu1 (!%p217_p2), %v780_v0  ;;  %v783_v3 = vld [vmem:[%s983_s3 + $0x18] sm:$0xff] (!%p217_p2)   ;;  %v869_v6 = vld [vmem:[%s981_s1] ss:$0 sm:$0xff] (!%p217_p2)  ;;  %v785_v17 = vld [vmem:[%s983_s3 + $0x28] sm:$0xff] (!%p217_p2)  }
   0x7   : > { %725 = vmatpush3.bf16.msra.mxu0 (!%p217_p2), %v780_v0  ;;  %764 = vmatpush3.bf16.msra.mxu1 (!%p217_p2), %v780_v0  ;;  %v876_v9 = vld [vmem:[%s982_s2] ss:$0 sm:$0xff] (!%p217_p2)  ;;  %v786_v40 = vld [vmem:[%s983_s3 + $0x30] sm:$0xff] (!%p217_p2)   ;;  %v787_v55 = vld [vmem:[%s983_s3 + $0x38] sm:$0xff] (!%p217_p2)  }
   0x8   : > { %726 = vmatprep.subr.bf16.mxu0 (!%p217_p2), %v781_v1  ;;  %757 = vmatprep.subr.bf16.mxu1 (!%p217_p2), %v781_v1  ;;  %v784_v12 = vld [vmem:[%s983_s3 + $0x20] sm:$0xff] (!%p217_p2)  }
   0xb   : > { %727 = vmatpush3.bf16.msra.mxu0 (!%p217_p2), %v781_v1  ;;  %765 = vmatpush3.bf16.msra.mxu1 (!%p217_p2), %v781_v1 }
   0xc   : > { %728 = vmatprep.subr.bf16.mxu0 (!%p217_p2), %v782_v2  ;;  %758 = vmatprep.subr.bf16.mxu1 (!%p217_p2), %v782_v2 }
   0xd   : > { %s988_s25 = smov (!%p251_p3, %s690_s25), 31  ;;  %s990_s22 = smov (!%p262_p4, %s837_s22), 1 }
   0xe   : > { %s691_s30 = sshll.u32 %s988_s25, 3  ;;  %s694_s25 = sshll.u32 %s990_s22, 1 }
   0xf   : > { %s859_s9 = scalar_lea.vmem %s980_s0, %s691_s30  ;;  %729 = vmatpush3.bf16.msra.mxu0 %v782_v2  ;;  %766 = vmatpush3.bf16.msra.mxu1 %v782_v2  ;;  %s942_s8 = scalar_lea.vmem %s985_s5, %s691_s30 }
  0x10   : > { %v267_v4 = vld [vmem:[%s859_s9] sm:$0xff]  ;;  %v268_v5 = vld [vmem:[%s859_s9 + $0x8] sm:$0xff]  ;;  %730 = vmatprep.subr.bf16.mxu0 %v783_v3  ;;  %759 = vmatprep.subr.bf16.mxu1 %v783_v3  ;;  %v269_v18 = vld [vmem:[%s859_s9 + $0x10] sm:$0xff]  ;;  %s265_s10 = scalar_lea.vmem %s986_s6, %s694_s25 }
  0x11   : > { %v290_v7 = vmul.f32 %v869_v6, %v267_v4  ;;  %v291_v8 = vmul.f32 %v869_v6, %v268_v5  ;;  %v275_v13 = vld [vmem:[%s859_s9 + $0x40] sm:$0xff]  ;;  %v276_v16 = vld [vmem:[%s859_s9 + $0x48] sm:$0xff]  ;;  %v270_v19 = vld [vmem:[%s859_s9 + $0x18] sm:$0xff]  ;;  %v292_v29 = vmul.f32 %v869_v6, %v269_v18 }
  0x12   : > { %v271_v21 = vld [vmem:[%s859_s9 + $0x20] sm:$0xff]  ;;  %v298_v22 = vmul.f32 %v869_v6, %v275_v13  ;;  %v277_v23 = vld [vmem:[%s859_s9 + $0x50] sm:$0xff]  ;;  %v278_v24 = vld [vmem:[%s859_s9 + $0x58] sm:$0xff]  ;;  %v299_v26 = vmul.f32 %v869_v6, %v276_v16  ;;  %v293_v30 = vmul.f32 %v869_v6, %v270_v19 }
  0x13   : > { %v313_v10 = vadd.f32 %v876_v9, %v290_v7  ;;  %v314_v11 = vadd.f32 %v876_v9, %v291_v8  ;;  %731 = vmatpush3.bf16.msra.mxu0 %v783_v3  ;;  %767 = vmatpush3.bf16.msra.mxu1 %v783_v3  ;;  %v272_v25 = vld [vmem:[%s859_s9 + $0x28] sm:$0xff]  ;;  %v279_v27 = vld [vmem:[%s859_s9 + $0x60] sm:$0xff]  ;;  %v294_v32 = vmul.f32 %v869_v6, %v271_v21  ;;  %v273_v45 = vld [vmem:[%s859_s9 + $0x30] sm:$0xff] }
  0x14   : > { %732 = vmatprep.subr.bf16.mxu0 %v784_v12  ;;  %760 = vmatprep.subr.bf16.mxu1 %v784_v12  ;;  %v280_v28 = vld [vmem:[%s859_s9 + $0x68] sm:$0xff]  ;;  %v321_v31 = vadd.f32 %v876_v9, %v298_v22  ;;  %v322_v33 = vadd.f32 %v876_v9, %v299_v26  ;;  %v300_v34 = vmul.f32 %v869_v6, %v277_v23  ;;  %v274_v46 = vld [vmem:[%s859_s9 + $0x38] sm:$0xff]  ;;  %v281_v53 = vld [vmem:[%s859_s9 + $0x70] sm:$0xff] }
  0x15   : > { %v329_v14 = vmax.f32 %v313_v10, 0.0  ;;  %v330_v15 = vmax.f32 %v314_v11, 0.0  ;;  %v301_v35 = vmul.f32 %v869_v6, %v278_v24  ;;  %v295_v36 = vmul.f32 %v869_v6, %v272_v25  ;;  %v282_v54 = vld [vmem:[%s859_s9 + $0x78] sm:$0xff] }
  0x16   : > { %v337_v37 = vmax.f32 %v321_v31, 0.0  ;;  %v302_v38 = vmul.f32 %v869_v6, %v279_v27  ;;  %v303_v39 = vmul.f32 %v869_v6, %v280_v28  ;;  %v338_v41 = vmax.f32 %v322_v33, 0.0 }
  0x17   : > { %v345_v20 = vpack.c.bf16 %v330_v15, %v329_v14  ;;  %733 = vmatpush3.bf16.msra.mxu0 %v784_v12  ;;  %768 = vmatpush3.bf16.msra.mxu1 %v784_v12  ;;  %v315_v42 = vadd.f32 %v876_v9, %v292_v29  ;;  %v316_v43 = vadd.f32 %v876_v9, %v293_v30 }
  0x18   : > { %734 = vmatprep.subr.bf16.mxu0 %v785_v17  ;;  %761 = vmatprep.subr.bf16.mxu1 %v785_v17  ;;  %v317_v44 = vadd.f32 %v876_v9, %v294_v32  ;;  %v349_v47 = vpack.c.bf16 %v338_v41, %v337_v37  ;;  %v323_v48 = vadd.f32 %v876_v9, %v300_v34 }
  0x19   : > { %740 = vmatprep.mubr.bf16.mxu0 %v345_v20  ;;  %v324_v49 = vadd.f32 %v876_v9, %v301_v35  ;;  %v318_v50 = vadd.f32 %v876_v9, %v295_v36  ;;  %v325_v51 = vadd.f32 %v876_v9, %v302_v38  ;;  %v326_v52 = vadd.f32 %v876_v9, %v303_v39 }
  0x1a   : > { %v331_v56 = vmax.f32 %v315_v42, 0.0  ;;  %v332_v57 = vmax.f32 %v316_v43, 0.0  ;;  %v296_v58 = vmul.f32 %v869_v6, %v273_v45  ;;  %v297_v59 = vmul.f32 %v869_v6, %v274_v46  ;;  %748 = vmatprep.mubr.bf16.mxu1 %v349_v47 }
  0x1b   : > { %735 = vmatpush3.bf16.msra.mxu0 %v785_v17  ;;  %769 = vmatpush3.bf16.msra.mxu1 %v785_v17  ;;  %v339_v60 = vmax.f32 %v323_v48, 0.0  ;;  %v340_v61 = vmax.f32 %v324_v49, 0.0  ;;  %v304_v62 = vmul.f32 %v869_v6, %v281_v53  ;;  %v305_v63 = vmul.f32 %v869_v6, %v282_v54 }
  0x1c   : > { %736 = vmatprep.subr.bf16.mxu0 %v786_v40  ;;  %762 = vmatprep.subr.bf16.mxu1 %v786_v40  ;;  %v333_v0 = vmax.f32 %v317_v44, 0.0  ;;  %v334_v1 = vmax.f32 %v318_v50, 0.0  ;;  %v341_v2 = vmax.f32 %v325_v51, 0.0  ;;  %v342_v3 = vmax.f32 %v326_v52, 0.0 }
  0x1d   : > { %v346_v4 = vpack.c.bf16 %v332_v57, %v331_v56  ;;  %v319_v5 = vadd.f32 %v876_v9, %v296_v58  ;;  %v320_v7 = vadd.f32 %v876_v9, %v297_v59  ;;  %v350_v8 = vpack.c.bf16 %v340_v61, %v339_v60 }
  0x1e   : > { %v327_v10 = vadd.f32 %v876_v9, %v304_v62  ;;  %v328_v11 = vadd.f32 %v876_v9, %v305_v63  ;;  %v347_v6 = vpack.c.bf16 %v334_v1, %v333_v0  ;;  %v351_v12 = vpack.c.bf16 %v342_v3, %v341_v2  ;;  %v697_v9 = vld [vmem:[%s984_s4] ss:$0 sm:$0xff] }
  0x1f   : > { %737 = vmatpush3.bf16.msra.mxu0 %v786_v40  ;;  %770 = vmatpush3.bf16.msra.mxu1 %v786_v40  ;;  %v335_v13 = vmax.f32 %v319_v5, 0.0  ;;  %v336_v14 = vmax.f32 %v320_v7, 0.0 }
  0x20   : > { %738 = vmatprep.subr.bf16.mxu0 %v787_v55  ;;  %763 = vmatprep.subr.bf16.mxu1 %v787_v55  ;;  %v343_v15 = vmax.f32 %v327_v10, 0.0  ;;  %v344_v16 = vmax.f32 %v328_v11, 0.0 }
  0x21   : > { %v348_v17 = vpack.c.bf16 %v336_v14, %v335_v13 }
  0x22   : > { %v352_v18 = vpack.c.bf16 %v344_v16, %v343_v15 }
  0x23   : > { %739 = vmatpush3.bf16.msra.mxu0 %v787_v55  ;;  %771 = vmatpush3.bf16.msra.mxu1 %v787_v55 }
  0x26   : > { %741 = vmatmul.mubr.bf16.vlgmr.msra.gmra.mrb[0].mxu0 %v346_v4  ;;  %749 = vmatmul.mubr.bf16.vlgmr.msra.gmra.mrb[0].mxu1 %v350_v8 }
  0x27   : > { %744 = vmatprep.mubr.bf16.mxu0 %v347_v6  ;;  %752 = vmatprep.mubr.bf16.mxu1 %v351_v12 }
  0x2e   : > { %745 = vmatmul.mubr.bf16.gmra.mrb[4].mxu0 %v348_v17  ;;  %753 = vmatmul.mubr.bf16.gmra.mrb[4].mxu1 %v352_v18 }
  0xf9   : > { %v742_v19 = vpop.f32.mrb[0].mxu0  ;;  %v750_v20 = vpop.f32.mrb[0].mxu1 }
  0xfa   : > { %v467_v21 = vadd.f32 %v742_v19, %v697_v9  ;;  %v458_v22 = vpop.f32.mrb[1].mxu0  ;;  %v944_v23 = vadd.f32 %v750_v20, %v697_v9  ;;  %v490_v24 = vpop.f32.mrb[1].mxu1 }
  0xfb   : > { %v459_v25 = vadd.f32 %v697_v9, %v458_v22  ;;  %v743_v26 = vpop.f32.mrb[2].mxu0  ;;  %v491_v27 = vadd.f32 %v697_v9, %v490_v24  ;;  %v751_v28 = vpop.f32.mrb[2].mxu1 }
  0xfc   : > { %523 = vst [vmem:[%s942_s8 + $0x10] sm:$0xff] %v467_v21  ;;  %v470_v29 = vadd.f32 %v743_v26, %v697_v9  ;;  %v461_v30 = vpop.f32.mrb[3].mxu0  ;;  %531 = vst [vmem:[%s942_s8 + $0x50] sm:$0xff] %v944_v23  ;;  %v949_v31 = vadd.f32 %v751_v28, %v697_v9  ;;  %v493_v32 = vpop.f32.mrb[3].mxu1  ;;  %v560_v38 = vmul.f32 %v467_v21, %v467_v21 }
  0xfd   : > { %521 = vst [vmem:[%s942_s8] sm:$0xff] %v459_v25  ;;  %v462_v33 = vadd.f32 %v697_v9, %v461_v30  ;;  %529 = vst [vmem:[%s942_s8 + $0x40] sm:$0xff] %v491_v27  ;;  %v494_v34 = vadd.f32 %v697_v9, %v493_v32  ;;  %v558_v35 = vmul.f32 %v459_v25, %v459_v25 }
  0xfe   : > { %524 = vst [vmem:[%s942_s8 + $0x18] sm:$0xff] %v470_v29  ;;  %532 = vst [vmem:[%s942_s8 + $0x58] sm:$0xff] %v949_v31  ;;  %v561_v43 = vmul.f32 %v470_v29, %v470_v29  ;;  %v566_v10 = vmul.f32 %v491_v27, %v491_v27  ;;  %v568_v15 = vmul.f32 %v944_v23, %v944_v23 }
  0xff   : > { %522 = vst [vmem:[%s942_s8 + $0x8] sm:$0xff] %v462_v33  ;;  %v537_v36 = vadd.f32 %v462_v33, %v459_v25  ;;  %v559_v37 = vmul.f32 %v462_v33, %v462_v33  ;;  %530 = vst [vmem:[%s942_s8 + $0x48] sm:$0xff] %v494_v34  ;;  %v567_v14 = vmul.f32 %v494_v34, %v494_v34 }
 0x100   : > { %v569_v18 = vmul.f32 %v949_v31, %v949_v31 }
 0x101   : > { %v538_v39 = vadd.f32 %v537_v36, %v467_v21  ;;  %v574_v40 = vadd.f32 %v559_v37, %v558_v35  ;;  %v746_v41 = vpop.f32.mrb[4].mxu0  ;;  %v754_v42 = vpop.f32.mrb[4].mxu1 }
 0x102   : > { %v483_v44 = vadd.f32 %v746_v41, %v697_v9  ;;  %v474_v45 = vpop.f32.mrb[5].mxu0  ;;  %v515_v46 = vadd.f32 %v754_v42, %v697_v9  ;;  %v506_v47 = vpop.f32.mrb[5].mxu1 }
 0x103   : > { %v575_v48 = vadd.f32 %v574_v40, %v560_v38  ;;  %v475_v49 = vadd.f32 %v697_v9, %v474_v45  ;;  %v539_v50 = vadd.f32 %v538_v39, %v470_v29  ;;  %v747_v51 = vpop.f32.mrb[6].mxu0  ;;  %v507_v52 = vadd.f32 %v697_v9, %v506_v47  ;;  %v755_v53 = vpop.f32.mrb[6].mxu1 }
 0x104   : > { %527 = vst [vmem:[%s942_s8 + $0x30] sm:$0xff] %v483_v44  ;;  %v486_v54 = vadd.f32 %v747_v51, %v697_v9  ;;  %v477_v55 = vpop.f32.mrb[7].mxu0  ;;  %535 = vst [vmem:[%s942_s8 + $0x70] sm:$0xff] %v515_v46  ;;  %v518_v56 = vadd.f32 %v755_v53, %v697_v9  ;;  %v509_v57 = vpop.f32.mrb[7].mxu1  ;;  %v564_v2 = vmul.f32 %v483_v44, %v483_v44 }
 0x105   : > { %525 = vst [vmem:[%s942_s8 + $0x20] sm:$0xff] %v475_v49  ;;  %v540_v58 = vadd.f32 %v539_v50, %v475_v49  ;;  %v562_v59 = vmul.f32 %v475_v49, %v475_v49  ;;  %v576_v60 = vadd.f32 %v575_v48, %v561_v43  ;;  %v478_v61 = vadd.f32 %v697_v9, %v477_v55 }
 0x106   : > { %533 = vst [vmem:[%s942_s8 + $0x60] sm:$0xff] %v507_v52  ;;  %528 = vst [vmem:[%s942_s8 + $0x38] sm:$0xff] %v486_v54  ;;  %v510_v62 = vadd.f32 %v697_v9, %v509_v57  ;;  %v565_v5 = vmul.f32 %v486_v54, %v486_v54  ;;  %v570_v20 = vmul.f32 %v507_v52, %v507_v52 }
 0x107   : > { %536 = vst [vmem:[%s942_s8 + $0x78] sm:$0xff] %v518_v56  ;;  %v577_v63 = vadd.f32 %v576_v60, %v562_v59  ;;  %526 = vst [vmem:[%s942_s8 + $0x28] sm:$0xff] %v478_v61  ;;  %v541_v0 = vadd.f32 %v540_v58, %v478_v61  ;;  %v563_v1 = vmul.f32 %v478_v61, %v478_v61 }
 0x108   : > { %534 = vst [vmem:[%s942_s8 + $0x68] sm:$0xff] %v510_v62  ;;  %v571_v26 = vmul.f32 %v510_v62, %v510_v62  ;;  %v573_v30 = vmul.f32 %v518_v56, %v518_v56 }
 0x109   : > { %v542_v3 = vadd.f32 %v541_v0, %v483_v44  ;;  %v578_v4 = vadd.f32 %v577_v63, %v563_v1 }
 0x10b   : > { %v579_v7 = vadd.f32 %v578_v4, %v564_v2  ;;  %v543_v8 = vadd.f32 %v542_v3, %v486_v54 }
 0x10d   : > { %v544_v11 = vadd.f32 %v543_v8, %v491_v27  ;;  %v580_v6 = vadd.f32 %v579_v7, %v565_v5  ;;  %v572_v27 = vmul.f32 %v515_v46, %v515_v46 }
 0x10f   : > { %v581_v12 = vadd.f32 %v580_v6, %v566_v10  ;;  %v545_v13 = vadd.f32 %v544_v11, %v494_v34 }
 0x111   : > { %v546_v16 = vadd.f32 %v545_v13, %v944_v23  ;;  %v582_v17 = vadd.f32 %v581_v12, %v567_v14 }
 0x113   : > { %v583_v9 = vadd.f32 %v582_v17, %v568_v15  ;;  %v547_v19 = vadd.f32 %v546_v16, %v949_v31 }
 0x115   : > { %v548_v21 = vadd.f32 %v547_v19, %v507_v52  ;;  %v584_v22 = vadd.f32 %v583_v9, %v569_v18 }
 0x117   : > { %v585_v24 = vadd.f32 %v584_v22, %v570_v20  ;;  %v549_v25 = vadd.f32 %v548_v21, %v510_v62 }
 0x119   : > { %v550_v28 = vadd.f32 %v549_v25, %v515_v46  ;;  %v586_v29 = vadd.f32 %v585_v24, %v571_v26 }
 0x11b   : > { %v551_v23 = vadd.f32 %v550_v28, %v518_v56  ;;  %v587_v32 = vadd.f32 %v586_v29, %v572_v27 }
 0x11d   : > { %v552_v33 = vrot.slane %v551_v23, 4  ;;  %v588_v34 = vadd.f32 %v587_v32, %v573_v30 }
 0x11f   : > { %v553_v35 = vadd.f32 %v552_v33, %v551_v23  ;;  %v589_v36 = vrot.slane %v588_v34, 4 }
 0x121   : > { %v554_v37 = vrot.slane %v553_v35, 2  ;;  %v590_v31 = vadd.f32 %v589_v36, %v588_v34 }
 0x123   : > { %v555_v38 = vadd.f32 %v554_v37, %v553_v35  ;;  %v591_v39 = vrot.slane %v590_v31, 2 }
 0x125   : > { %v556_v40 = vrot.slane %v555_v38, 1  ;;  %v592_v41 = vadd.f32 %v591_v39, %v590_v31 }
 0x127   : > { %v593_v42 = vrot.slane %v592_v41, 1  ;;  %v557_v43 = vadd.f32 %v556_v40, %v555_v38 }
 0x129   : > { %v594_v44 = vadd.f32 %v593_v42, %v592_v41 }
 0x12b   : > { %v596_v45 = vsel %vm595_vm0, %v557_v43, %v594_v44 }
 0x12c   : > { %597 = vst [vmem:[%s265_s10] sm:$0x3] %v596_v45 }
 0x12d PF: > { %s17_s21 = sadd.s32 1, %s794_s21  }
 0x12e   : > { %p14_p5 = scmp.ge.s32.totalorder %s17_s21, 4  }
 0x130   :  { %16 = sbr.rel (!%p14_p5) target bundleno = 1 (0x1), region = 82 }

// kernel: _lambda_.6
= control target key start
LH: loop header
LB: loop body
LE: loop exit
PB: predicated region body
PF: predicated region fallthrough
CT: control target
= control target key end

     0   :  { %s915_s24 = smov 0   ;;  %s1113_s0 = inlined_call_operand.vmem [shape: f32[256,128], index: 0, kind: input, shape index: {}]   ;;  %s1114_s1 = inlined_call_operand.vmem [shape: f32[256,128], index: 1, kind: input, shape index: {}]   ;;  %s1115_s2 = inlined_call_operand.vmem [shape: f32[1,128], index: 2, kind: input, shape index: {}]   ;;  %s1116_s3 = inlined_call_operand.vmem [shape: f32[1,128], index: 3, kind: input, shape index: {}]   ;;  %s1117_s4 = inlined_call_operand.vmem [shape: bf16[128,128], index: 4, kind: input, shape index: {}]   ;;  %s1118_s5 = inlined_call_operand.vmem [shape: f32[1,128], index: 5, kind: input, shape index: {}]   ;;  %s1119_s6 = inlined_call_operand.vmem [shape: f32[256,128], index: 6, kind: output, shape index: {0}]   ;;  %s1120_s7 = inlined_call_operand.vmem [shape: f32[2,2,128], index: 7, kind: output, shape index: {1}]  }
   0x1 LB: > { %s921_s25 = sadd.s32 4294967295, %s873_s24   ;;  %p766_p0 = scmp.ge.s32.totalorder %s873_s24, 1  ;;  %s873_s24 = sphi %s915_s24, %s18_s24  }
   0x2   : > { %p252_p1 = scmp.lt.s32.totalorder %s873_s24, 3 }
   0x4   : > { %p253_p2 = pnand %p766_p0, %p252_p1 }
   0x5   : > { %v859_v0 = vld [vmem:[%s1117_s4] sm:$0xff] (!%p253_p2)   ;;  %s767_s28 = sshll.u32 (!%p253_p2), %s921_s25, 4  ;;  %v860_v1 = vld [vmem:[%s1117_s4 + $0x8] sm:$0xff] (!%p253_p2)   ;;  %v861_v2 = vld [vmem:[%s1117_s4 + $0x10] sm:$0xff] (!%p253_p2)   ;;  %p311_p4 = scmp.lt.s32.totalorder (!%p253_p2), %s921_s25, 1  ;;  %vm660_vm0 = vcmask (!%p253_p2), 1040384  }
   0x6   : > { %256 = sbr.rel (%p253_p2) target bundleno = 304 (0x130), region = 44  ;;  %p294_p3 = scmp.lt.s32.totalorder (!%p253_p2), %s767_s28, 31  ;;  %803 = vmatprep.subr.bf16.mxu0 (!%p253_p2), %v859_v0  ;;  %835 = vmatprep.subr.bf16.mxu1 (!%p253_p2), %v859_v0  ;;  %v862_v3 = vld [vmem:[%s1117_s4 + $0x18] sm:$0xff] (!%p253_p2)   ;;  %v863_v9 = vld [vmem:[%s1117_s4 + $0x20] sm:$0xff] (!%p253_p2)   ;;  %v864_v11 = vld [vmem:[%s1117_s4 + $0x28] sm:$0xff] (!%p253_p2)  }
   0x7   : > { %804 = vmatpush3.bf16.msra.mxu0 (!%p253_p2), %v859_v0  ;;  %843 = vmatpush3.bf16.msra.mxu1 (!%p253_p2), %v859_v0  ;;  %v865_v12 = vld [vmem:[%s1117_s4 + $0x30] sm:$0xff] (!%p253_p2)   ;;  %v866_v13 = vld [vmem:[%s1117_s4 + $0x38] sm:$0xff] (!%p253_p2)   ;;  %v984_v33 = vld [vmem:[%s1115_s2] ss:$0 sm:$0xff] (!%p253_p2) }
   0x8   : > { %805 = vmatprep.subr.bf16.mxu0 (!%p253_p2), %v860_v1  ;;  %836 = vmatprep.subr.bf16.mxu1 (!%p253_p2), %v860_v1  ;;  %v999_v44 = vld [vmem:[%s1116_s3] ss:$0 sm:$0xff] (!%p253_p2) }
   0x9   : > { %v1014_v55 = vld [vmem:[%s1118_s5] ss:$0 sm:$0xff] (!%p253_p2) }
   0xb   : > { %806 = vmatpush3.bf16.msra.mxu0 (!%p253_p2), %v860_v1  ;;  %844 = vmatpush3.bf16.msra.mxu1 (!%p253_p2), %v860_v1 }
   0xc   : > { %807 = vmatprep.subr.bf16.mxu0 (!%p253_p2), %v861_v2  ;;  %837 = vmatprep.subr.bf16.mxu1 (!%p253_p2), %v861_v2 }
   0xd   : > { %s1122_s28 = smov (!%p294_p3, %s767_s28), 31  ;;  %s1124_s25 = smov (!%p311_p4, %s921_s25), 1 }
   0xe   : > { %s935_s10 = sshll.u32 %s1122_s28, 3 }
   0xf   : > { %s941_s13 = scalar_lea.vmem %s1114_s1, %s935_s10  ;;  %808 = vmatpush3.bf16.msra.mxu0 %v861_v2  ;;  %845 = vmatpush3.bf16.msra.mxu1 %v861_v2  ;;  %s978_s28 = scalar_lea.vmem %s1113_s0, %s935_s10 }
  0x10   : > { %v378_v4 = vld [vmem:[%s941_s13] sm:$0xff]  ;;  %v379_v5 = vld [vmem:[%s941_s13 + $0x8] sm:$0xff]  ;;  %809 = vmatprep.subr.bf16.mxu0 %v862_v3  ;;  %838 = vmatprep.subr.bf16.mxu1 %v862_v3  ;;  %v380_v14 = vld [vmem:[%s941_s13 + $0x10] sm:$0xff]  ;;  %s1037_s15 = scalar_lea.vmem %s1119_s6, %s935_s10  ;;  %s773_s10 = sshll.u32 %s1124_s25, 1 }
  0x11   : > { %v394_v6 = vpack.c.bf16 %v379_v5, %v378_v4  ;;  %v386_v7 = vld [vmem:[%s941_s13 + $0x40] sm:$0xff]  ;;  %v387_v8 = vld [vmem:[%s941_s13 + $0x48] sm:$0xff]  ;;  %v381_v15 = vld [vmem:[%s941_s13 + $0x18] sm:$0xff]  ;;  %s314_s18 = scalar_lea.vmem %s1120_s7, %s773_s10 }
  0x12   : > { %v398_v10 = vpack.c.bf16 %v387_v8, %v386_v7  ;;  %v382_v16 = vld [vmem:[%s941_s13 + $0x20] sm:$0xff]  ;;  %v388_v17 = vld [vmem:[%s941_s13 + $0x50] sm:$0xff]  ;;  %v389_v18 = vld [vmem:[%s941_s13 + $0x58] sm:$0xff]  ;;  %v395_v22 = vpack.c.bf16 %v381_v15, %v380_v14 }
  0x13   : > { %819 = vmatprep.mubr.bf16.mxu0 %v394_v6  ;;  %810 = vmatpush3.bf16.msra.mxu0 %v862_v3  ;;  %v383_v19 = vld [vmem:[%s941_s13 + $0x28] sm:$0xff]  ;;  %v390_v20 = vld [vmem:[%s941_s13 + $0x60] sm:$0xff]  ;;  %v399_v23 = vpack.c.bf16 %v389_v18, %v388_v17  ;;  %v384_v26 = vld [vmem:[%s941_s13 + $0x30] sm:$0xff] }
  0x14   : > { %827 = vmatprep.mubr.bf16.mxu1 %v398_v10  ;;  %846 = vmatpush3.bf16.msra.mxu1 %v862_v3  ;;  %v391_v21 = vld [vmem:[%s941_s13 + $0x68] sm:$0xff]  ;;  %v396_v24 = vpack.c.bf16 %v383_v19, %v382_v16  ;;  %v385_v27 = vld [vmem:[%s941_s13 + $0x38] sm:$0xff]  ;;  %v392_v28 = vld [vmem:[%s941_s13 + $0x70] sm:$0xff] }
  0x15   : > { %811 = vmatprep.subr.bf16.mxu0 %v863_v9  ;;  %839 = vmatprep.subr.bf16.mxu1 %v863_v9  ;;  %v400_v25 = vpack.c.bf16 %v391_v21, %v390_v20  ;;  %v393_v29 = vld [vmem:[%s941_s13 + $0x78] sm:$0xff]  ;;  %v397_v30 = vpack.c.bf16 %v385_v27, %v384_v26  ;;  %v318_v32 = vld [vmem:[%s978_s28 + $0x10] sm:$0xff]  ;;  %v316_v34 = vld [vmem:[%s978_s28] sm:$0xff] }
  0x16   : > { %v401_v31 = vpack.c.bf16 %v393_v29, %v392_v28  ;;  %v319_v35 = vld [vmem:[%s978_s28 + $0x18] sm:$0xff]  ;;  %v317_v36 = vld [vmem:[%s978_s28 + $0x8] sm:$0xff]  ;;  %v326_v37 = vld [vmem:[%s978_s28 + $0x50] sm:$0xff]  ;;  %v341_v40 = vmul.f32 %v984_v33, %v318_v32  ;;  %v339_v41 = vmul.f32 %v984_v33, %v316_v34 }
  0x17   : > { %812 = vmatpush3.bf16.msra.mxu0 %v863_v9  ;;  %v324_v38 = vld [vmem:[%s978_s28 + $0x40] sm:$0xff]  ;;  %v327_v39 = vld [vmem:[%s978_s28 + $0x58] sm:$0xff]  ;;  %v342_v42 = vmul.f32 %v984_v33, %v319_v35  ;;  %v325_v43 = vld [vmem:[%s978_s28 + $0x48] sm:$0xff]  ;;  %v340_v45 = vmul.f32 %v984_v33, %v317_v36  ;;  %v349_v46 = vmul.f32 %v984_v33, %v326_v37 }
  0x18   : > { %847 = vmatpush3.bf16.msra.mxu1 %v863_v9  ;;  %813 = vmatprep.subr.bf16.mxu0 %v864_v11  ;;  %v322_v47 = vld [vmem:[%s978_s28 + $0x30] sm:$0xff]  ;;  %v320_v48 = vld [vmem:[%s978_s28 + $0x20] sm:$0xff]  ;;  %v347_v49 = vmul.f32 %v984_v33, %v324_v38  ;;  %v350_v50 = vmul.f32 %v984_v33, %v327_v39  ;;  %v323_v51 = vld [vmem:[%s978_s28 + $0x38] sm:$0xff]  ;;  %v348_v53 = vmul.f32 %v984_v33, %v325_v43 }
  0x19   : > { %840 = vmatprep.subr.bf16.mxu1 %v864_v11  ;;  %v321_v52 = vld [vmem:[%s978_s28 + $0x28] sm:$0xff]  ;;  %v364_v54 = vadd.f32 %v999_v44, %v341_v40  ;;  %v362_v56 = vadd.f32 %v999_v44, %v339_v41  ;;  %v365_v57 = vadd.f32 %v999_v44, %v342_v42  ;;  %v330_v58 = vld [vmem:[%s978_s28 + $0x70] sm:$0xff]  ;;  %v363_v59 = vadd.f32 %v999_v44, %v340_v45  ;;  %v328_v63 = vld [vmem:[%s978_s28 + $0x60] sm:$0xff] }
  0x1a   : > { %v345_v60 = vmul.f32 %v984_v33, %v322_v47  ;;  %v343_v61 = vmul.f32 %v984_v33, %v320_v48  ;;  %v372_v62 = vadd.f32 %v999_v44, %v349_v46  ;;  %v331_v0 = vld [vmem:[%s978_s28 + $0x78] sm:$0xff]  ;;  %v346_v2 = vmul.f32 %v984_v33, %v323_v51  ;;  %v329_v29 = vld [vmem:[%s978_s28 + $0x68] sm:$0xff] }
  0x1b   : > { %814 = vmatpush3.bf16.msra.mxu0 %v864_v11  ;;  %v344_v3 = vmul.f32 %v984_v33, %v321_v52  ;;  %v370_v5 = vadd.f32 %v999_v44, %v347_v49  ;;  %v373_v6 = vadd.f32 %v999_v44, %v350_v50  ;;  %v351_v17 = vmul.f32 %v984_v33, %v328_v63 }
  0x1c   : > { %848 = vmatpush3.bf16.msra.mxu1 %v864_v11  ;;  %815 = vmatprep.subr.bf16.mxu0 %v865_v12  ;;  %v371_v11 = vadd.f32 %v999_v44, %v348_v53  ;;  %v354_v18 = vmul.f32 %v984_v33, %v331_v0  ;;  %v366_v35 = vadd.f32 %v999_v44, %v343_v61 }
  0x1d   : > { %841 = vmatprep.subr.bf16.mxu1 %v865_v12  ;;  %v369_v36 = vadd.f32 %v999_v44, %v346_v2  ;;  %v367_v38 = vadd.f32 %v999_v44, %v344_v3  ;;  %v374_v40 = vadd.f32 %v999_v44, %v351_v17  ;;  %v352_v41 = vmul.f32 %v984_v33, %v329_v29 }
  0x1e   : > { %v377_v48 = vadd.f32 %v999_v44, %v354_v18 }
  0x1f   : > { %816 = vmatpush3.bf16.msra.mxu0 %v865_v12 }
  0x20   : > { %849 = vmatpush3.bf16.msra.mxu1 %v865_v12  ;;  %817 = vmatprep.subr.bf16.mxu0 %v866_v13  ;;  %v353_v12 = vmul.f32 %v984_v33, %v330_v58 }
  0x21   : > { %842 = vmatprep.subr.bf16.mxu1 %v866_v13 }
  0x22   : > { %v376_v39 = vadd.f32 %v999_v44, %v353_v12 }
  0x23   : > { %818 = vmatpush3.bf16.msra.mxu0 %v866_v13 }
  0x24   : > { %850 = vmatpush3.bf16.msra.mxu1 %v866_v13 }
  0x26   : > { %820 = vmatmul.mubr.bf16.vlgmr.msra.gmra.mrb[0].mxu0 %v395_v22 }
  0x27   : > { %828 = vmatmul.mubr.bf16.vlgmr.msra.gmra.mrb[0].mxu1 %v399_v23  ;;  %823 = vmatprep.mubr.bf16.mxu0 %v396_v24 }
  0x28   : > { %831 = vmatprep.mubr.bf16.mxu1 %v400_v25 }
  0x2e   : > { %824 = vmatmul.mubr.bf16.gmra.mrb[4].mxu0 %v397_v30 }
  0x2f   : > { %832 = vmatmul.mubr.bf16.gmra.mrb[4].mxu1 %v401_v31  ;;  %v368_v31 = vadd.f32 %v999_v44, %v345_v60 }
  0xf9   : > { %v821_v1 = vpop.f32.mrb[0].mxu0 }
  0xfa   : > { %v829_v4 = vpop.f32.mrb[0].mxu1  ;;  %v516_v7 = vadd.f32 %v821_v1, %v1014_v55  ;;  %v507_v8 = vpop.f32.mrb[1].mxu0 }
  0xfb   : > { %v548_v9 = vadd.f32 %v829_v4, %v1014_v55  ;;  %v539_v10 = vpop.f32.mrb[1].mxu1  ;;  %v508_v13 = vadd.f32 %v1014_v55, %v507_v8  ;;  %v822_v14 = vpop.f32.mrb[2].mxu0 }
  0xfc   : > { %v540_v15 = vadd.f32 %v1014_v55, %v539_v10  ;;  %v830_v16 = vpop.f32.mrb[2].mxu1  ;;  %v572_v19 = vadd.f32 %v516_v7, %v364_v54  ;;  %v519_v20 = vadd.f32 %v822_v14, %v1014_v55  ;;  %v510_v21 = vpop.f32.mrb[3].mxu0 }
  0xfd   : > { %v1044_v22 = vadd.f32 %v548_v9, %v372_v62  ;;  %v551_v23 = vadd.f32 %v830_v16, %v1014_v55  ;;  %v542_v24 = vpop.f32.mrb[3].mxu1  ;;  %v570_v25 = vadd.f32 %v508_v13, %v362_v56  ;;  %v511_v26 = vadd.f32 %v1014_v55, %v510_v21 }
  0xfe   : > { %v1048_v27 = vadd.f32 %v540_v15, %v370_v5  ;;  %v543_v28 = vadd.f32 %v1014_v55, %v542_v24  ;;  %588 = vst [vmem:[%s1037_s15 + $0x10] sm:$0xff] %v572_v19  ;;  %v573_v30 = vadd.f32 %v519_v20, %v365_v57  ;;  %v625_v49 = vmul.f32 %v572_v19, %v572_v19 }
  0xff   : > { %596 = vst [vmem:[%s1037_s15 + $0x50] sm:$0xff] %v1044_v22  ;;  %v1056_v32 = vadd.f32 %v551_v23, %v373_v6  ;;  %586 = vst [vmem:[%s1037_s15] sm:$0xff] %v570_v25  ;;  %v571_v34 = vadd.f32 %v511_v26, %v363_v59  ;;  %v623_v42 = vmul.f32 %v570_v25, %v570_v25 }
 0x100   : > { %594 = vst [vmem:[%s1037_s15 + $0x40] sm:$0xff] %v1048_v27  ;;  %v1063_v37 = vadd.f32 %v543_v28, %v371_v11  ;;  %589 = vst [vmem:[%s1037_s15 + $0x18] sm:$0xff] %v573_v30  ;;  %v626_v50 = vmul.f32 %v573_v30, %v573_v30  ;;  %v375_v9 = vadd.f32 %v999_v44, %v352_v41 }
 0x101   : > { %597 = vst [vmem:[%s1037_s15 + $0x58] sm:$0xff] %v1056_v32  ;;  %587 = vst [vmem:[%s1037_s15 + $0x8] sm:$0xff] %v571_v34  ;;  %v602_v43 = vadd.f32 %v571_v34, %v570_v25  ;;  %v624_v45 = vmul.f32 %v571_v34, %v571_v34  ;;  %v825_v46 = vpop.f32.mrb[4].mxu0  ;;  %v631_v26 = vmul.f32 %v1048_v27, %v1048_v27 }
 0x102   : > { %595 = vst [vmem:[%s1037_s15 + $0x48] sm:$0xff] %v1063_v37  ;;  %v833_v47 = vpop.f32.mrb[4].mxu1  ;;  %v532_v51 = vadd.f32 %v825_v46, %v1014_v55  ;;  %v523_v52 = vpop.f32.mrb[5].mxu0  ;;  %v633_v34 = vmul.f32 %v1044_v22, %v1044_v22 }
 0x103   : > { %v564_v53 = vadd.f32 %v833_v47, %v1014_v55  ;;  %v555_v54 = vpop.f32.mrb[5].mxu1  ;;  %v603_v56 = vadd.f32 %v602_v43, %v572_v19  ;;  %v639_v33 = vadd.f32 %v624_v45, %v623_v42  ;;  %v524_v57 = vadd.f32 %v1014_v55, %v523_v52  ;;  %v826_v58 = vpop.f32.mrb[6].mxu0 }
 0x104   : > { %v556_v59 = vadd.f32 %v1014_v55, %v555_v54  ;;  %v834_v60 = vpop.f32.mrb[6].mxu1  ;;  %v576_v61 = vadd.f32 %v532_v51, %v368_v31  ;;  %v535_v62 = vadd.f32 %v826_v58, %v1014_v55  ;;  %v526_v63 = vpop.f32.mrb[7].mxu0  ;;  %v632_v31 = vmul.f32 %v1063_v37, %v1063_v37 }
 0x105   : > { %v584_v0 = vadd.f32 %v564_v53, %v376_v39  ;;  %v567_v1 = vadd.f32 %v834_v60, %v1014_v55  ;;  %v558_v2 = vpop.f32.mrb[7].mxu1  ;;  %v640_v3 = vadd.f32 %v639_v33, %v625_v49  ;;  %v574_v4 = vadd.f32 %v524_v57, %v366_v35 }
 0x106   : > { %v604_v5 = vadd.f32 %v603_v56, %v573_v30  ;;  %v527_v6 = vadd.f32 %v1014_v55, %v526_v63  ;;  %592 = vst [vmem:[%s1037_s15 + $0x30] sm:$0xff] %v576_v61  ;;  %v577_v7 = vadd.f32 %v535_v62, %v369_v36  ;;  %v582_v8 = vadd.f32 %v556_v59, %v374_v40 }
 0x107   : > { %600 = vst [vmem:[%s1037_s15 + $0x70] sm:$0xff] %v584_v0  ;;  %590 = vst [vmem:[%s1037_s15 + $0x20] sm:$0xff] %v574_v4  ;;  %v627_v11 = vmul.f32 %v574_v4, %v574_v4  ;;  %v641_v12 = vadd.f32 %v640_v3, %v626_v50  ;;  %v585_v14 = vadd.f32 %v567_v1, %v377_v48 }
 0x108   : > { %v605_v10 = vadd.f32 %v604_v5, %v574_v4  ;;  %v575_v13 = vadd.f32 %v527_v6, %v367_v38  ;;  %593 = vst [vmem:[%s1037_s15 + $0x38] sm:$0xff] %v577_v7  ;;  %598 = vst [vmem:[%s1037_s15 + $0x60] sm:$0xff] %v582_v8  ;;  %v559_v15 = vadd.f32 %v1014_v55, %v558_v2 }
 0x109   : > { %v642_v16 = vadd.f32 %v641_v12, %v627_v11  ;;  %601 = vst [vmem:[%s1037_s15 + $0x78] sm:$0xff] %v585_v14  ;;  %v629_v20 = vmul.f32 %v576_v61, %v576_v61  ;;  %v630_v23 = vmul.f32 %v577_v7, %v577_v7  ;;  %v634_v38 = vmul.f32 %v1056_v32, %v1056_v32 }
 0x10a   : > { %591 = vst [vmem:[%s1037_s15 + $0x28] sm:$0xff] %v575_v13  ;;  %v606_v17 = vadd.f32 %v605_v10, %v575_v13  ;;  %v628_v18 = vmul.f32 %v575_v13, %v575_v13  ;;  %v583_v19 = vadd.f32 %v559_v15, %v375_v9  ;;  %v635_v40 = vmul.f32 %v582_v8, %v582_v8 }
 0x10b   : > { %v637_v46 = vmul.f32 %v584_v0, %v584_v0  ;;  %v638_v49 = vmul.f32 %v585_v14, %v585_v14 }
 0x10c   : > { %v607_v21 = vadd.f32 %v606_v17, %v576_v61  ;;  %v643_v44 = vadd.f32 %v642_v16, %v628_v18  ;;  %599 = vst [vmem:[%s1037_s15 + $0x68] sm:$0xff] %v583_v19 }
 0x10e   : > { %v644_v24 = vadd.f32 %v643_v44, %v629_v20  ;;  %v608_v25 = vadd.f32 %v607_v21, %v577_v7 }
 0x110   : > { %v609_v28 = vadd.f32 %v608_v25, %v1048_v27  ;;  %v645_v29 = vadd.f32 %v644_v24, %v630_v23 }
 0x112   : > { %v646_v55 = vadd.f32 %v645_v29, %v631_v26  ;;  %v610_v30 = vadd.f32 %v609_v28, %v1063_v37  ;;  %v636_v37 = vmul.f32 %v583_v19, %v583_v19 }
 0x114   : > { %v611_v35 = vadd.f32 %v610_v30, %v1044_v22  ;;  %v647_v36 = vadd.f32 %v646_v55, %v632_v31 }
 0x116   : > { %v648_v39 = vadd.f32 %v647_v36, %v633_v34  ;;  %v612_v27 = vadd.f32 %v611_v35, %v1056_v32 }
 0x118   : > { %v613_v41 = vadd.f32 %v612_v27, %v582_v8  ;;  %v649_v42 = vadd.f32 %v648_v39, %v634_v38 }
 0x11a   : > { %v650_v43 = vadd.f32 %v649_v42, %v635_v40  ;;  %v614_v45 = vadd.f32 %v613_v41, %v583_v19 }
 0x11c   : > { %v615_v47 = vadd.f32 %v614_v45, %v584_v0  ;;  %v651_v48 = vadd.f32 %v650_v43, %v636_v37 }
 0x11e   : > { %v616_v22 = vadd.f32 %v615_v47, %v585_v14  ;;  %v652_v50 = vadd.f32 %v651_v48, %v637_v46 }
 0x120   : > { %v617_v51 = vrot.slane %v616_v22, 4  ;;  %v653_v52 = vadd.f32 %v652_v50, %v638_v49 }
 0x122   : > { %v618_v53 = vadd.f32 %v617_v51, %v616_v22  ;;  %v654_v54 = vrot.slane %v653_v52, 4 }
 0x124   : > { %v619_v56 = vrot.slane %v618_v53, 2  ;;  %v655_v32 = vadd.f32 %v654_v54, %v653_v52 }
 0x126   : > { %v620_v33 = vadd.f32 %v619_v56, %v618_v53  ;;  %v656_v57 = vrot.slane %v655_v32, 2 }
 0x128   : > { %v621_v58 = vrot.slane %v620_v33, 1  ;;  %v657_v59 = vadd.f32 %v656_v57, %v655_v32 }
 0x12a   : > { %v658_v60 = vrot.slane %v657_v59, 1  ;;  %v622_v61 = vadd.f32 %v621_v58, %v620_v33 }
 0x12c   : > { %v659_v62 = vadd.f32 %v658_v60, %v657_v59 }
 0x12e   : > { %v661_v63 = vsel %vm660_vm0, %v622_v61, %v659_v62 }
 0x12f   : > { %662 = vst [vmem:[%s314_s18] sm:$0x3] %v661_v63 }
 0x130 PF: > { %s18_s24 = sadd.s32 1, %s873_s24  }
 0x131   : > { %p15_p5 = scmp.ge.s32.totalorder %s18_s24, 4  }
 0x133   :  { %17 = sbr.rel (!%p15_p5) target bundleno = 1 (0x1), region = 89 }

</bundles_post_ra>
